<compile_context>
chip_gen: v6e
topology: v6e:2x2x1
jax: 0.10.0
libtpu: 0.0.40
codegen_flags: <defaults>
</compile_context>

<pallas_src>
import jax
import jax.numpy as jnp
from jax.experimental import pallas as pl
from jax.experimental.pallas import tpu as pltpu

OBS_DIM = 4
OBS_PAD = 16                     # obs padded to 16 lanes (bf16-tile friendly), zeros past 4
HIDDEN = 256                     # LSTM hidden size
XH_DIM = HIDDEN + OBS_PAD        # fused [h | x] row length = 272
MLP_DIM = 64                     # real pi-net hidden sizes [64, 64]
MLP_PAD = 128                    # padded to full lane width
ACT_DIM = 2                      # soccer robot: (forward, turn)
ACT_PAD = 128                    # lane-dense action head; real actions = first ACT_DIM lanes


def _policy_kernel(eps_ref, obs_ref, states_ref, w_lstm_ref, b_lstm_ref,
                   w_head_ref, b_head_ref, out_ref):
    H = HIDDEN
    eps = eps_ref[0, 0]                       # episode_start scalar (0. or 1.) from SMEM

    x = obs_ref[...]                          # (1, OBS_PAD) f32, zero past OBS_DIM
    h_in = states_ref[0:2, :]                 # rows: (h_pi, h_vf)
    c_in = states_ref[2:4, :]                 # rows: (c_pi, c_vf)
    h = h_in - h_in * eps                     # == h_in * (1 - episode_start)
    c = c_in - c_in * eps

    # Fused LSTM input rows [h | x]; obs shared by both rows. One dot per cell.
    x2 = jnp.concatenate([x, x], axis=0)                            # (2, OBS_PAD)
    xh = jnp.concatenate([h, x2], axis=1).astype(jnp.bfloat16)      # (2, XH_DIM)

    g_pi = jnp.dot(xh[0:1, :], w_lstm_ref[0],
                   preferred_element_type=jnp.float32)              # (1, 4H)
    g_vf = jnp.dot(xh[1:2, :], w_lstm_ref[1],
                   preferred_element_type=jnp.float32)              # (1, 4H)
    gates = jnp.concatenate([g_pi, g_vf], axis=0) + b_lstm_ref[...]  # (2, 4H)

    # Gate layout along 4H is (i, f, o, g): one wide sigmoid + one tanh.
    sig = jax.nn.sigmoid(gates[:, 0:3 * H])                         # (2, 3H)
    i_g = sig[:, 0:H]
    f_g = sig[:, H:2 * H]
    o_g = sig[:, 2 * H:3 * H]
    g_g = jnp.tanh(gates[:, 3 * H:4 * H])                           # (2, H)

    c_new = f_g * c + i_g * g_g                                     # (2, H)
    h_new = o_g * jnp.tanh(c_new)                                   # (2, H)

    # pi MLP extractor on the actor hidden: 256 -> 128(pad of 64) -> 128(pad), tanh.
    lat = jnp.tanh(
        jnp.dot(h_new[0:1, :].astype(jnp.bfloat16), w_head_ref[0:H, :],
                preferred_element_type=jnp.float32) + b_head_ref[0:1, :])
    lat = jnp.tanh(
        jnp.dot(lat.astype(jnp.bfloat16), w_head_ref[H:H + MLP_PAD, :],
                preferred_element_type=jnp.float32) + b_head_ref[1:2, :])
    # Action head; b_head row 2 already holds ba + exp(log_std) * noise.
    act = jnp.dot(lat.astype(jnp.bfloat16),
                  w_head_ref[H + MLP_PAD:H + 2 * MLP_PAD, :],
                  preferred_element_type=jnp.float32) + b_head_ref[2:3, :]   # (1, ACT_PAD)

    # Single packed, lane-dense output: rows 0-1 new h (pi, vf), 2-3 new c (pi, vf), 4 action row.
    out_ref[0:2, :] = h_new
    out_ref[2:4, :] = c_new
    out_ref[4:5, :] = jnp.concatenate(
        [act, jnp.zeros((1, H - ACT_PAD), jnp.float32)], axis=1)


def _full_spec(shape):
    return pl.BlockSpec(shape, lambda i: (0,) * len(shape))


@jax.jit
def onnx_wrapped_policy_forward(obs, h_pi, c_pi, h_vf, c_vf, episode_starts,
                                params, noise):
    """Mirrors ONNXWrappedPolicy.forward for B=1: obs (1,4) f32, h/c states (1,1,256) f32,
    episode_starts (1,) f32, noise (1, ACT_PAD) f32."""
    B = obs.shape[0]               # == 1 per the reference module
    H = HIDDEN

    # Glue: pad obs, stack states as rows (h_pi, h_vf, c_pi, c_vf), fold the Gaussian
    # sample into the action-head bias row, pack the small biases into one array.
    obs_p = jnp.zeros((1, OBS_PAD), jnp.float32).at[:, :OBS_DIM].set(obs)
    eps = episode_starts.reshape(1, 1).astype(jnp.float32)
    states = jnp.concatenate(
        [h_pi.reshape(1, H), h_vf.reshape(1, H),
         c_pi.reshape(1, H), c_vf.reshape(1, H)], axis=0)            # (4, H)
    b_act = params["ba"] + jnp.exp(params["log_std"]) * noise        # (1, ACT_PAD)
    b_head = jnp.concatenate([params["b1"], params["b2"], b_act], axis=0)  # (3, ACT_PAD)

    inputs = (eps, obs_p, states, params["w_lstm"], params["b_lstm"],
              params["w_head"], b_head)

    out = pl.pallas_call(
        _policy_kernel,
        out_shape=jax.ShapeDtypeStruct((5, H), jnp.float32),
        grid_spec=pltpu.PrefetchScalarGridSpec(
            num_scalar_prefetch=0,
            grid=(1,),
            in_specs=[
                pl.BlockSpec(memory_space=pltpu.MemorySpace.SMEM),   # episode_starts
                _full_spec(obs_p.shape),
                _full_spec(states.shape),
                _full_spec(params["w_lstm"].shape),
                _full_spec(params["b_lstm"].shape),
                _full_spec(params["w_head"].shape),
                _full_spec(b_head.shape),
            ],
            out_specs=_full_spec((5, H)),
        ),
        compiler_params=pltpu.CompilerParams(
            dimension_semantics=("arbitrary",),
        ),
    )(*inputs)

    actions = out[4:5, :ACT_DIM]
    new_h_pi = out[0].reshape(1, B, H)
    new_h_vf = out[1].reshape(1, B, H)
    new_c_pi = out[2].reshape(1, B, H)
    new_c_vf = out[3].reshape(1, B, H)
    return actions, new_h_pi, new_c_pi, new_h_vf, new_c_vf


def _ifgo_to_ifog(w):
    """Reorder the 4H gate axis from PyTorch (i, f, g, o) to kernel (i, f, o, g)."""
    H = HIDDEN
    return jnp.concatenate(
        [w[..., 0:H], w[..., H:2 * H], w[..., 3 * H:4 * H], w[..., 2 * H:3 * H]],
        axis=-1)


def make_params(key):
    """Deterministic synthetic policy parameters (shapes per sb3 MlpLstmPolicy:
    lstm_actor / lstm_critic (in=4, hidden=256), pi net [64, 64], action dim 2),
    pre-packed for the kernel."""
    ks = jax.random.split(key, 12)
    s = 0.1

    def nrm(k, shape):
        return (s * jax.random.normal(k, shape)).astype(jnp.float32)

    G = 4 * HIDDEN

    def fused_lstm_weight(k_ih, k_hh):
        # Fused [w_hh ; w_ih] so the cell is one dot of [h | x_pad]; rows past OBS_DIM
        # in the x block are zero so the padded contraction is exact.
        w_ih = _ifgo_to_ifog(nrm(k_ih, (OBS_DIM, G)))
        w_hh = _ifgo_to_ifog(nrm(k_hh, (HIDDEN, G)))
        fused = jnp.zeros((XH_DIM, G), jnp.float32)
        fused = fused.at[:HIDDEN, :].set(w_hh)
        fused = fused.at[HIDDEN:HIDDEN + OBS_DIM, :].set(w_ih)
        return fused

    w_lstm = jnp.stack(
        [fused_lstm_weight(ks[0], ks[1]),      # actor
         fused_lstm_weight(ks[2], ks[3])],     # critic
        axis=0).astype(jnp.bfloat16)            # (2, XH_DIM, 4H) bf16

    b_lstm = jnp.concatenate(
        [_ifgo_to_ifog(nrm(ks[4], (1, G))),     # b_ih + b_hh folded (actor)
         _ifgo_to_ifog(nrm(ks[5], (1, G)))],    # (critic)
        axis=0)                                 # (2, 4H) f32

    # pi MLP + action head, zero padded 64 -> 128 (exact: tanh(0)=0 through zero rows).
    w1 = jnp.zeros((HIDDEN, MLP_PAD), jnp.float32).at[:, :MLP_DIM].set(
        nrm(ks[6], (HIDDEN, MLP_DIM)))
    b1 = jnp.zeros((1, MLP_PAD), jnp.float32).at[:, :MLP_DIM].set(
        nrm(ks[7], (1, MLP_DIM)))
    w2 = jnp.zeros((MLP_PAD, MLP_PAD), jnp.float32).at[:MLP_DIM, :MLP_DIM].set(
        nrm(ks[8], (MLP_DIM, MLP_DIM)))
    b2 = jnp.zeros((1, MLP_PAD), jnp.float32).at[:, :MLP_DIM].set(
        nrm(ks[9], (1, MLP_DIM)))
    wa = jnp.zeros((MLP_PAD, ACT_PAD), jnp.float32).at[:MLP_DIM, :ACT_DIM].set(
        nrm(ks[10], (MLP_DIM, ACT_DIM)))
    w_head = jnp.concatenate([w1, w2, wa], axis=0).astype(jnp.bfloat16)  # (512, 128) bf16

    ba = jnp.zeros((1, ACT_PAD), jnp.float32)
    log_std = jnp.zeros((1, ACT_PAD), jnp.float32)   # sb3 init: zeros
    return dict(w_lstm=w_lstm, b_lstm=b_lstm, w_head=w_head,
                b1=b1, b2=b2, ba=ba, log_std=log_std)


def _reference_forward(obs, h_pi, c_pi, h_vf, c_vf, eps, params, noise):
    """Pure-JAX reference using the same packed params / bf16 matmul operands."""
    H = HIDDEN
    mask = (1.0 - eps).reshape(1, 1)
    x = jnp.zeros((1, OBS_PAD), jnp.float32).at[:, :OBS_DIM].set(obs)

    def cell(h, c, w_fused, b):
        xh = jnp.concatenate([h, x], axis=1).astype(jnp.bfloat16)
        g = jnp.dot(xh, w_fused, preferred_element_type=jnp.float32) + b
        i_g = jax.nn.sigmoid(g[:, 0:H])
        f_g = jax.nn.sigmoid(g[:, H:2 * H])
        o_g = jax.nn.sigmoid(g[:, 2 * H:3 * H])
        g_g = jnp.tanh(g[:, 3 * H:4 * H])
        c_new = f_g * c + i_g * g_g
        return o_g * jnp.tanh(c_new), c_new

    nh_pi, nc_pi = cell(h_pi.reshape(1, H) * mask, c_pi.reshape(1, H) * mask,
                        params["w_lstm"][0], params["b_lstm"][0:1])
    nh_vf, nc_vf = cell(h_vf.reshape(1, H) * mask, c_vf.reshape(1, H) * mask,
                        params["w_lstm"][1], params["b_lstm"][1:2])

    w_head = params["w_head"]
    lat = jnp.tanh(jnp.dot(nh_pi.astype(jnp.bfloat16), w_head[0:H],
                           preferred_element_type=jnp.float32) + params["b1"])
    lat = jnp.tanh(jnp.dot(lat.astype(jnp.bfloat16), w_head[H:H + MLP_PAD],
                           preferred_element_type=jnp.float32) + params["b2"])
    mean = jnp.dot(lat.astype(jnp.bfloat16), w_head[H + MLP_PAD:],
                   preferred_element_type=jnp.float32) + params["ba"]
    act = (mean + jnp.exp(params["log_std"]) * noise)[:, :ACT_DIM]
    return act, nh_pi, nc_pi, nh_vf, nc_vf


def _check(outs, ref):
    actions, nh_pi, nc_pi, nh_vf, nc_vf = outs
    got = (actions, nh_pi.reshape(1, HIDDEN), nc_pi.reshape(1, HIDDEN),
           nh_vf.reshape(1, HIDDEN), nc_vf.reshape(1, HIDDEN))
    for g, w in zip(got, ref):
        assert jnp.allclose(g, w, atol=2e-3, rtol=2e-3)


if __name__ == "__main__":
    key = jax.random.PRNGKey(0)
    k_obs, k_par, k_noise = jax.random.split(key, 3)

    # Inputs matching the PyTorch reference module.
    obs = jax.random.uniform(k_obs, (1, OBS_DIM), jnp.float32)
    h_pi = jnp.zeros((1, 1, HIDDEN), jnp.float32)
    c_pi = jnp.zeros((1, 1, HIDDEN), jnp.float32)
    h_vf = jnp.zeros((1, 1, HIDDEN), jnp.float32)
    c_vf = jnp.zeros((1, 1, HIDDEN), jnp.float32)
    episode_starts = jnp.zeros((1,), jnp.float32)

    params = make_params(k_par)
    noise = jax.random.normal(k_noise, (1, ACT_PAD), jnp.float32)

    outs = onnx_wrapped_policy_forward(obs, h_pi, c_pi, h_vf, c_vf,
                                       episode_starts, params, noise)
    outs = jax.block_until_ready(outs)
    _check(outs, _reference_forward(obs, h_pi, c_pi, h_vf, c_vf,
                                    episode_starts, params, noise))

    # Second check with non-zero recurrent state to exercise the state/mask path.
    kh = jax.random.split(jax.random.PRNGKey(1), 4)
    rh_pi, rc_pi, rh_vf, rc_vf = [
        (0.5 * jax.random.normal(k, (1, 1, HIDDEN))).astype(jnp.float32) for k in kh]
    outs2 = onnx_wrapped_policy_forward(obs, rh_pi, rc_pi, rh_vf, rc_vf,
                                        episode_starts, params, noise)
    outs2 = jax.block_until_ready(outs2)
    _check(outs2, _reference_forward(obs, rh_pi, rc_pi, rh_vf, rc_vf,
                                     episode_starts, params, noise))

    actions, nh_pi, nc_pi, nh_vf, nc_vf = outs
    assert actions.shape == (1, ACT_DIM)
    assert nh_pi.shape == (1, 1, HIDDEN) and nc_vf.shape == (1, 1, HIDDEN)
    print("KERNEL_OK")
</pallas_src>

<mosaic_0001>
module attributes {stable_mosaic.version = 11 : i64} {
  func.func @_policy_kernel(%arg0: i32, %arg1: memref<1x1xf32, #tpu.memory_space<smem>>, %arg2: memref<1x16xf32, #tpu.memory_space<vmem>>, %arg3: memref<4x256xf32, #tpu.memory_space<vmem>>, %arg4: memref<2x272x1024xbf16, #tpu.memory_space<vmem>>, %arg5: memref<2x1024xf32, #tpu.memory_space<vmem>>, %arg6: memref<512x128xbf16, #tpu.memory_space<vmem>>, %arg7: memref<3x128xf32, #tpu.memory_space<vmem>>, %arg8: memref<5x256xf32, #tpu.memory_space<vmem>>) attributes {dimension_semantics = [#tpu.dimension_semantics<arbitrary>], iteration_bounds = array<i64: 1>, scalar_prefetch = 0 : i64, scratch_operands = 0 : i64, tpu.core_type = #tpu.core_type<tc>, window_params = [{transform_indices = @transform_0, window_bounds = array<i64: 1, 1>}, {pipeline_mode = #tpu.pipeline_mode<synchronous>, transform_indices = @transform_1, window_bounds = array<i64: 1, 16>}, {pipeline_mode = #tpu.pipeline_mode<synchronous>, transform_indices = @transform_2, window_bounds = array<i64: 4, 256>}, {pipeline_mode = #tpu.pipeline_mode<synchronous>, transform_indices = @transform_3, window_bounds = array<i64: 2, 272, 1024>}, {pipeline_mode = #tpu.pipeline_mode<synchronous>, transform_indices = @transform_4, window_bounds = array<i64: 2, 1024>}, {pipeline_mode = #tpu.pipeline_mode<synchronous>, transform_indices = @transform_5, window_bounds = array<i64: 512, 128>}, {pipeline_mode = #tpu.pipeline_mode<synchronous>, transform_indices = @transform_6, window_bounds = array<i64: 3, 128>}, {pipeline_mode = #tpu.pipeline_mode<synchronous>, transform_indices = @transform_7, window_bounds = array<i64: 5, 256>}]} {
    %c0 = arith.constant 0 : index
    %c0_0 = arith.constant 0 : index
    %0 = memref.load %arg1[%c0, %c0_0] : memref<1x1xf32, #tpu.memory_space<smem>>
    %c0_1 = arith.constant 0 : index
    %c0_2 = arith.constant 0 : index
    %1 = vector.load %arg2[%c0_1, %c0_2] : memref<1x16xf32, #tpu.memory_space<vmem>>, vector<1x16xf32>
    %c0_3 = arith.constant 0 : index
    %c0_4 = arith.constant 0 : index
    %2 = vector.load %arg3[%c0_3, %c0_4] : memref<4x256xf32, #tpu.memory_space<vmem>>, vector<2x256xf32>
    %c2 = arith.constant 2 : index
    %c0_5 = arith.constant 0 : index
    %3 = vector.load %arg3[%c2, %c0_5] : memref<4x256xf32, #tpu.memory_space<vmem>>, vector<2x256xf32>
    %4 = vector.broadcast %0 : f32 to vector<2x256xf32>
    %5 = arith.mulf %2, %4 : vector<2x256xf32>
    %6 = arith.subf %2, %5 : vector<2x256xf32>
    %7 = vector.broadcast %0 : f32 to vector<2x256xf32>
    %8 = arith.mulf %3, %7 : vector<2x256xf32>
    %9 = arith.subf %3, %8 : vector<2x256xf32>
    %10 = tpu.concatenate %1, %1 in 0 : vector<1x16xf32>, vector<1x16xf32> -> vector<2x16xf32>
    %11 = tpu.concatenate %6, %10 in 1 : vector<2x256xf32>, vector<2x16xf32> -> vector<2x272xf32>
    %12 = arith.truncf %11 : vector<2x272xf32> to vector<2x272xbf16>
    %13 = vector.extract_strided_slice %12 {offsets = [0, 0], sizes = [1, 272], strides = [1, 1]} : vector<2x272xbf16> to vector<1x272xbf16>
    %c0_6 = arith.constant 0 : index
    %c0_7 = arith.constant 0 : index
    %c0_8 = arith.constant 0 : index
    %14 = vector.load %arg4[%c0_6, %c0_7, %c0_8] : memref<2x272x1024xbf16, #tpu.memory_space<vmem>>, vector<1x272x1024xbf16>
    %15 = vector.shape_cast %14 : vector<1x272x1024xbf16> to vector<272x1024xbf16>
    %cst = arith.constant dense<0.000000e+00> : vector<1x1024xf32>
    %16 = tpu.matmul %13, %15, %cst {dimension_numbers = #tpu.dot_dimension_numbers<[1], [0], [0], [1], [0, 0, 1, 1], [], []>} : vector<1x272xbf16>, vector<272x1024xbf16>, vector<1x1024xf32> -> vector<1x1024xf32>
    %17 = vector.extract_strided_slice %12 {offsets = [1, 0], sizes = [1, 272], strides = [1, 1]} : vector<2x272xbf16> to vector<1x272xbf16>
    %c1 = arith.constant 1 : index
    %c0_9 = arith.constant 0 : index
    %c0_10 = arith.constant 0 : index
    %18 = vector.load %arg4[%c1, %c0_9, %c0_10] : memref<2x272x1024xbf16, #tpu.memory_space<vmem>>, vector<1x272x1024xbf16>
    %19 = vector.shape_cast %18 : vector<1x272x1024xbf16> to vector<272x1024xbf16>
    %cst_11 = arith.constant dense<0.000000e+00> : vector<1x1024xf32>
    %20 = tpu.matmul %17, %19, %cst_11 {dimension_numbers = #tpu.dot_dimension_numbers<[1], [0], [0], [1], [0, 0, 1, 1], [], []>} : vector<1x272xbf16>, vector<272x1024xbf16>, vector<1x1024xf32> -> vector<1x1024xf32>
    %21 = tpu.concatenate %16, %20 in 0 : vector<1x1024xf32>, vector<1x1024xf32> -> vector<2x1024xf32>
    %c0_12 = arith.constant 0 : index
    %c0_13 = arith.constant 0 : index
    %22 = vector.load %arg5[%c0_12, %c0_13] : memref<2x1024xf32, #tpu.memory_space<vmem>>, vector<2x1024xf32>
    %23 = arith.addf %21, %22 : vector<2x1024xf32>
    %24 = vector.extract_strided_slice %23 {offsets = [0, 0], sizes = [2, 768], strides = [1, 1]} : vector<2x1024xf32> to vector<2x768xf32>
    %25 = arith.negf %24 : vector<2x768xf32>
    %26 = math.exp %25 : vector<2x768xf32>
    %cst_14 = arith.constant 1.000000e+00 : f32
    %27 = vector.broadcast %cst_14 : f32 to vector<2x768xf32>
    %28 = arith.addf %27, %26 : vector<2x768xf32>
    %29 = arith.divf %27, %28 : vector<2x768xf32>
    %30 = vector.extract_strided_slice %29 {offsets = [0, 0], sizes = [2, 256], strides = [1, 1]} : vector<2x768xf32> to vector<2x256xf32>
    %31 = vector.extract_strided_slice %29 {offsets = [0, 256], sizes = [2, 256], strides = [1, 1]} : vector<2x768xf32> to vector<2x256xf32>
    %32 = vector.extract_strided_slice %29 {offsets = [0, 512], sizes = [2, 256], strides = [1, 1]} : vector<2x768xf32> to vector<2x256xf32>
    %33 = vector.extract_strided_slice %23 {offsets = [0, 768], sizes = [2, 256], strides = [1, 1]} : vector<2x1024xf32> to vector<2x256xf32>
    %34 = math.tanh %33 : vector<2x256xf32>
    %35 = arith.mulf %31, %9 : vector<2x256xf32>
    %36 = arith.mulf %30, %34 : vector<2x256xf32>
    %37 = arith.addf %35, %36 : vector<2x256xf32>
    %38 = math.tanh %37 : vector<2x256xf32>
    %39 = arith.mulf %32, %38 : vector<2x256xf32>
    %40 = vector.extract_strided_slice %39 {offsets = [0, 0], sizes = [1, 256], strides = [1, 1]} : vector<2x256xf32> to vector<1x256xf32>
    %41 = arith.truncf %40 : vector<1x256xf32> to vector<1x256xbf16>
    %c0_15 = arith.constant 0 : index
    %c0_16 = arith.constant 0 : index
    %42 = vector.load %arg6[%c0_15, %c0_16] : memref<512x128xbf16, #tpu.memory_space<vmem>>, vector<256x128xbf16>
    %cst_17 = arith.constant dense<0.000000e+00> : vector<1x128xf32>
    %43 = tpu.matmul %41, %42, %cst_17 {dimension_numbers = #tpu.dot_dimension_numbers<[1], [0], [0], [1], [0, 0, 1, 1], [], []>} : vector<1x256xbf16>, vector<256x128xbf16>, vector<1x128xf32> -> vector<1x128xf32>
    %c0_18 = arith.constant 0 : index
    %c0_19 = arith.constant 0 : index
    %44 = vector.load %arg7[%c0_18, %c0_19] : memref<3x128xf32, #tpu.memory_space<vmem>>, vector<1x128xf32>
    %45 = arith.addf %43, %44 : vector<1x128xf32>
    %46 = math.tanh %45 : vector<1x128xf32>
    %47 = arith.truncf %46 : vector<1x128xf32> to vector<1x128xbf16>
    %c256 = arith.constant 256 : index
    %c0_20 = arith.constant 0 : index
    %48 = vector.load %arg6[%c256, %c0_20] : memref<512x128xbf16, #tpu.memory_space<vmem>>, vector<128x128xbf16>
    %cst_21 = arith.constant dense<0.000000e+00> : vector<1x128xf32>
    %49 = tpu.matmul %47, %48, %cst_21 {dimension_numbers = #tpu.dot_dimension_numbers<[1], [0], [0], [1], [0, 0, 1, 1], [], []>} : vector<1x128xbf16>, vector<128x128xbf16>, vector<1x128xf32> -> vector<1x128xf32>
    %c1_22 = arith.constant 1 : index
    %c0_23 = arith.constant 0 : index
    %50 = vector.load %arg7[%c1_22, %c0_23] : memref<3x128xf32, #tpu.memory_space<vmem>>, vector<1x128xf32>
    %51 = arith.addf %49, %50 : vector<1x128xf32>
    %52 = math.tanh %51 : vector<1x128xf32>
    %53 = arith.truncf %52 : vector<1x128xf32> to vector<1x128xbf16>
    %c384 = arith.constant 384 : index
    %c0_24 = arith.constant 0 : index
    %54 = vector.load %arg6[%c384, %c0_24] : memref<512x128xbf16, #tpu.memory_space<vmem>>, vector<128x128xbf16>
    %cst_25 = arith.constant dense<0.000000e+00> : vector<1x128xf32>
    %55 = tpu.matmul %53, %54, %cst_25 {dimension_numbers = #tpu.dot_dimension_numbers<[1], [0], [0], [1], [0, 0, 1, 1], [], []>} : vector<1x128xbf16>, vector<128x128xbf16>, vector<1x128xf32> -> vector<1x128xf32>
    %c2_26 = arith.constant 2 : index
    %c0_27 = arith.constant 0 : index
    %56 = vector.load %arg7[%c2_26, %c0_27] : memref<3x128xf32, #tpu.memory_space<vmem>>, vector<1x128xf32>
    %57 = arith.addf %55, %56 : vector<1x128xf32>
    %c0_28 = arith.constant 0 : index
    %c0_29 = arith.constant 0 : index
    %58 = vector.load %arg8[%c0_28, %c0_29] : memref<5x256xf32, #tpu.memory_space<vmem>>, vector<2x256xf32>
    tpu.vector_store %arg8[%c0_28, %c0_29], %39 {strides = array<i32>} : memref<5x256xf32, #tpu.memory_space<vmem>>, vector<2x256xf32>,
    %c2_30 = arith.constant 2 : index
    %c0_31 = arith.constant 0 : index
    %59 = vector.load %arg8[%c2_30, %c0_31] : memref<5x256xf32, #tpu.memory_space<vmem>>, vector<2x256xf32>
    tpu.vector_store %arg8[%c2_30, %c0_31], %37 {strides = array<i32>} : memref<5x256xf32, #tpu.memory_space<vmem>>, vector<2x256xf32>,
    %cst_32 = arith.constant 0.000000e+00 : f32
    %60 = vector.broadcast %cst_32 : f32 to vector<1x128xf32>
    %61 = tpu.concatenate %57, %60 in 1 : vector<1x128xf32>, vector<1x128xf32> -> vector<1x256xf32>
    %c4 = arith.constant 4 : index
    %c0_33 = arith.constant 0 : index
    %62 = vector.load %arg8[%c4, %c0_33] : memref<5x256xf32, #tpu.memory_space<vmem>>, vector<1x256xf32>
    tpu.vector_store %arg8[%c4, %c0_33], %61 {strides = array<i32>} : memref<5x256xf32, #tpu.memory_space<vmem>>, vector<1x256xf32>,
    return
  }
  func.func @transform_0(%arg0: i32) -> (i32, i32) {
    %c0_i32 = arith.constant 0 : i32
    %c0_i32_0 = arith.constant 0 : i32
    %c0_i32_1 = arith.constant 0 : i32
    return %c0_i32, %c0_i32_0 : i32, i32
  }
  func.func @transform_1(%arg0: i32) -> (i32, i32) {
    %c0_i32 = arith.constant 0 : i32
    %c0_i32_0 = arith.constant 0 : i32
    %c0_i32_1 = arith.constant 0 : i32
    return %c0_i32, %c0_i32_0 : i32, i32
  }
  func.func @transform_2(%arg0: i32) -> (i32, i32) {
    %c0_i32 = arith.constant 0 : i32
    %c0_i32_0 = arith.constant 0 : i32
    %c0_i32_1 = arith.constant 0 : i32
    return %c0_i32, %c0_i32_0 : i32, i32
  }
  func.func @transform_3(%arg0: i32) -> (i32, i32, i32) {
    %c0_i32 = arith.constant 0 : i32
    %c0_i32_0 = arith.constant 0 : i32
    %c0_i32_1 = arith.constant 0 : i32
    %c0_i32_2 = arith.constant 0 : i32
    return %c0_i32, %c0_i32_0, %c0_i32_1 : i32, i32, i32
  }
  func.func @transform_4(%arg0: i32) -> (i32, i32) {
    %c0_i32 = arith.constant 0 : i32
    %c0_i32_0 = arith.constant 0 : i32
    %c0_i32_1 = arith.constant 0 : i32
    return %c0_i32, %c0_i32_0 : i32, i32
  }
  func.func @transform_5(%arg0: i32) -> (i32, i32) {
    %c0_i32 = arith.constant 0 : i32
    %c0_i32_0 = arith.constant 0 : i32
    %c0_i32_1 = arith.constant 0 : i32
    return %c0_i32, %c0_i32_0 : i32, i32
  }
  func.func @transform_6(%arg0: i32) -> (i32, i32) {
    %c0_i32 = arith.constant 0 : i32
    %c0_i32_0 = arith.constant 0 : i32
    %c0_i32_1 = arith.constant 0 : i32
    return %c0_i32, %c0_i32_0 : i32, i32
  }
  func.func @transform_7(%arg0: i32) -> (i32, i32) {
    %c0_i32 = arith.constant 0 : i32
    %c0_i32_0 = arith.constant 0 : i32
    %c0_i32_1 = arith.constant 0 : i32
    return %c0_i32, %c0_i32_0 : i32, i32
  }
}

</mosaic_0001>

<bundles_post_ra>
// kernel: onnx_wrapped_policy_forward.1
= control target key start
LH: loop header
LB: loop body
LE: loop exit
PB: predicated region body
PF: predicated region fallthrough
CT: control target
= control target key end

     0   :  { %13 = vsyncpa [#allocation4], 0  ;;  %s3744_s0 = inlined_call_operand.<no memory space> [shape: f32[1,1], index: 0, kind: input, shape index: {}]   ;;  %s3745_s1 = inlined_call_operand.vmem [shape: f32[1,16], index: 1, kind: input, shape index: {}]   ;;  %s3746_s2 = inlined_call_operand.vmem [shape: f32[4,256], index: 2, kind: input, shape index: {}]   ;;  %s3747_s3 = inlined_call_operand.hbm [shape: bf16[2,272,1024], index: 3, kind: input, shape index: {}]   ;;  %s3748_s4 = inlined_call_operand.hbm [shape: f32[2,1024], index: 4, kind: input, shape index: {}]   ;;  %s3749_s5 = inlined_call_operand.hbm [shape: bf16[512,128], index: 5, kind: input, shape index: {}]   ;;  %s3750_s6 = inlined_call_operand.vmem [shape: f32[3,128], index: 6, kind: input, shape index: {}]   ;;  %s3751_s7 = inlined_call_operand.vmem [shape: f32[5,256], index: 7, kind: output, shape index: {}]  }
   0x1   :  { %14 = vsyncpa [#allocation6], 0  ;;  %s3507_s24 = smov [#allocation5]   ;;  %s3508_s26 = smov [#allocation3]  }
   0x2   :  { %s39_s25 = sshll.u32 %s3507_s24, 4  ;;  %s26_s27 = sshll.u32 %s3508_s26, 4  ;;  %s40_s25 = int_to_ptr.vmem [resolvable:$true] %s39_s25  ;;  %s27_s27 = int_to_ptr.vmem [resolvable:$true] %s26_s27 }
   0x3   :  { %s3451_s28 = scalar_lea.vmem %s40_s25, 256  ;;  %p3456_p1 = scmp.lt.s32.totalorder %s40_s25, %s40_s25 }
   0x4   :  { %p3452_p0 = scmp.ne.s32.totalorder %s40_s25, %s3451_s28  ;;  %p3457_p2 = scmp.lt.s32.totalorder %s3451_s28, %s3451_s28 }
   0x6   :  { %p3458_p3 = por %p3457_p2, %p3456_p1 }
   0x8   :  { %p3459_p4 = pnand %p3458_p3, %p3452_p0 }
   0xa   :  { %3462 = shalt.err (!%p3459_p4)
}
   0xb   :  { %42 = dma.hbm_to_vmem [thread:$0]  %s3748_s4, 256, %s40_s25, [#allocation6]  }
   0xc   :  { %s3471_s8 = scalar_lea.vmem %s27_s27, 34816  ;;  %p3476_p6 = scmp.lt.s32.totalorder %s27_s27, %s27_s27 }
   0xd   :  { %p3472_p5 = scmp.ne.s32.totalorder %s27_s27, %s3471_s8  ;;  %p3477_p7 = scmp.lt.s32.totalorder %s3471_s8, %s3471_s8 }
   0xf   :  { %p3478_p8 = por %p3477_p7, %p3476_p6 }
  0x11   :  { %p3479_p9 = pnand %p3478_p8, %p3472_p5 }
  0x13   :  { %3482 = shalt.err (!%p3479_p9)
}
  0x14   :  { %s3509_s9 = smov 512   ;;  %s3510_s10 = smov 32  }
  0x15   :  { %32 = dma.hbm_to_vmem [thread:$0]  %s3747_s3, 34816, %s27_s27, [#allocation4], %s3509_s9, %s3509_s9, %s3510_s10  }
  0x16   :  { %s3511_s13 = smov [#allocation7]  }
  0x17   :  { %s48_s14 = sshll.u32 %s3511_s13, 4  ;;  %s49_s14 = int_to_ptr.vmem [resolvable:$true] %s48_s14 }
  0x18   :  { %s3491_s15 = scalar_lea.vmem %s49_s14, 4096  ;;  %p3496_p11 = scmp.lt.s32.totalorder %s49_s14, %s49_s14 }
  0x19   :  { %p3492_p10 = scmp.ne.s32.totalorder %s49_s14, %s3491_s15  ;;  %p3497_p12 = scmp.lt.s32.totalorder %s3491_s15, %s3491_s15 }
  0x1b   :  { %p3498_p13 = por %p3497_p12, %p3496_p11 }
  0x1d   :  { %p3499_p0 = pnand %p3498_p13, %p3492_p10 }
  0x1f   :  { %3502 = shalt.err (!%p3499_p0)
}
  0x20   :  { %s3512_s4 = smov 64   ;;  %s3513_s16 = smov 4  }
  0x21   :  { %54 = dma.hbm_to_vmem [thread:$0]  %s3749_s5, 4096, %s49_s14, [#allocation6], %s3512_s4, %s3512_s4, %s3513_s16  }
  0x22   :  { %3503 = dma.done.wait [#allocation4], 34816  }
  0x23   :  { %3504 = vsyncadd [#allocation4], 4294932480 }
  0x24   :  { %3505 = dma.done.wait [#allocation6], 4352  }
  0x25   :  { %3506 = vsyncadd [#allocation6], 4294962944  ;;  %v146_v0 = vld [vmem:[#allocation3 + $0x1c0] sm:$0xff]  ;;  %v147_v2 = vld [vmem:[#allocation3 + $0x1c8] sm:$0xff]  ;;  %v71_v50 = vstv %s3744_s0  ;;  %vm82_vm0 = vcmask 1040384   ;;  %vm906_vm1 = vcmask 130048  }
  0x26   :  { %v150_v1 = vld [vmem:[#allocation3 + $0x1e0] sm:$0xff]  ;;  %v151_v4 = vld [vmem:[#allocation3 + $0x1e8] sm:$0xff]  ;;  %vm3517_vm2 = vmmov 0  }
  0x27   :  { %v3019_v3 = vcombine.high %v146_v0, %v150_v1  ;;  %v3018_v5 = vcombine.low %v146_v0, %v150_v1  ;;  %v138_v6 = vld [vmem:[#allocation3 + $0x180] sm:$0xff]  ;;  %v3021_v8 = vcombine.high %v147_v2, %v151_v4  ;;  %v3020_v9 = vcombine.low %v147_v2, %v151_v4  ;;  %v139_v11 = vld [vmem:[#allocation3 + $0x188] sm:$0xff] }
  0x28   :  { %v142_v7 = vld [vmem:[#allocation3 + $0x1a0] sm:$0xff]  ;;  %v143_v12 = vld [vmem:[#allocation3 + $0x1a8] sm:$0xff] }
  0x29   :  { %v3011_v10 = vcombine.high %v138_v6, %v142_v7  ;;  %v130_v13 = vld [vmem:[#allocation3 + $0x140] sm:$0xff]  ;;  %910 = vmatprep.subr.bf16.mxu0 %v3019_v3  ;;  %v3013_v14 = vcombine.high %v139_v11, %v143_v12  ;;  %v131_v16 = vld [vmem:[#allocation3 + $0x148] sm:$0xff]  ;;  %992 = vmatprep.subr.bf16.mxu1 %v3021_v8  ;;  %v3010_v18 = vcombine.low %v138_v6, %v142_v7 }
  0x2a   :  { %v134_v15 = vld [vmem:[#allocation3 + $0x160] sm:$0xff]  ;;  %v135_v17 = vld [vmem:[#allocation3 + $0x168] sm:$0xff]  ;;  %911 = vmatpush1.bf16.msra.mxu0 %v3018_v5  ;;  %993 = vmatpush1.bf16.msra.mxu1 %v3020_v9  ;;  %v3012_v19 = vcombine.low %v139_v11, %v143_v12 }
  0x2b   :  { %912 = vmatprep.subr.bf16.mxu0 %v3011_v10  ;;  %v3003_v20 = vcombine.high %v130_v13, %v134_v15  ;;  %994 = vmatprep.subr.bf16.mxu1 %v3013_v14  ;;  %v3005_v21 = vcombine.high %v131_v16, %v135_v17  ;;  %v122_v22 = vld [vmem:[#allocation3 + $0x100] sm:$0xff]  ;;  %v123_v24 = vld [vmem:[#allocation3 + $0x108] sm:$0xff]  ;;  %v3002_v26 = vcombine.low %v130_v13, %v134_v15 }
  0x2c   :  { %v126_v23 = vld [vmem:[#allocation3 + $0x120] sm:$0xff]  ;;  %v127_v25 = vld [vmem:[#allocation3 + $0x128] sm:$0xff]  ;;  %v3004_v27 = vcombine.low %v131_v16, %v135_v17 }
  0x2d   :  { %v2995_v28 = vcombine.high %v122_v22, %v126_v23  ;;  %v2997_v29 = vcombine.high %v123_v24, %v127_v25  ;;  %v114_v30 = vld [vmem:[#allocation3 + $0xc0] sm:$0xff]  ;;  %v115_v32 = vld [vmem:[#allocation3 + $0xc8] sm:$0xff]  ;;  %v2994_v34 = vcombine.low %v122_v22, %v126_v23  ;;  %v2996_v35 = vcombine.low %v123_v24, %v127_v25 }
  0x2e   :  { %913 = vmatpush1.bf16.msra.mxu0 %v3010_v18  ;;  %995 = vmatpush1.bf16.msra.mxu1 %v3012_v19  ;;  %v118_v31 = vld [vmem:[#allocation3 + $0xe0] sm:$0xff]  ;;  %v119_v33 = vld [vmem:[#allocation3 + $0xe8] sm:$0xff] }
  0x2f   :  { %914 = vmatprep.subr.bf16.mxu0 %v3003_v20  ;;  %996 = vmatprep.subr.bf16.mxu1 %v3005_v21  ;;  %v2987_v36 = vcombine.high %v114_v30, %v118_v31  ;;  %v2989_v37 = vcombine.high %v115_v32, %v119_v33  ;;  %v106_v38 = vld [vmem:[#allocation3 + $0x80] sm:$0xff]  ;;  %v107_v40 = vld [vmem:[#allocation3 + $0x88] sm:$0xff]  ;;  %v2986_v42 = vcombine.low %v114_v30, %v118_v31 }
  0x30   :  { %v110_v39 = vld [vmem:[#allocation3 + $0xa0] sm:$0xff]  ;;  %v111_v41 = vld [vmem:[#allocation3 + $0xa8] sm:$0xff]  ;;  %v2988_v43 = vcombine.low %v115_v32, %v119_v33 }
  0x31   :  { %v2979_v44 = vcombine.high %v106_v38, %v110_v39  ;;  %v2981_v45 = vcombine.high %v107_v40, %v111_v41  ;;  %v98_v46 = vld [vmem:[#allocation3 + $0x40] sm:$0xff]  ;;  %v99_v48 = vld [vmem:[#allocation3 + $0x48] sm:$0xff]  ;;  %v2978_v51 = vcombine.low %v106_v38, %v110_v39  ;;  %v2980_v52 = vcombine.low %v107_v40, %v111_v41 }
  0x32   :  { %915 = vmatpush1.bf16.msra.mxu0 %v3002_v26  ;;  %997 = vmatpush1.bf16.msra.mxu1 %v3004_v27  ;;  %v102_v47 = vld [vmem:[#allocation3 + $0x60] sm:$0xff]  ;;  %v103_v49 = vld [vmem:[#allocation3 + $0x68] sm:$0xff] }
  0x33   :  { %916 = vmatprep.subr.bf16.mxu0 %v2995_v28  ;;  %998 = vmatprep.subr.bf16.mxu1 %v2997_v29  ;;  %v2971_v53 = vcombine.high %v98_v46, %v102_v47  ;;  %v69_v54 = vld [vmem:[%s3746_s2] sm:$0x33]  ;;  %v2973_v55 = vcombine.high %v99_v48, %v103_v49  ;;  %v91_v59 = vld [vmem:[#allocation3 + $0x8] sm:$0xff]  ;;  %v2970_v61 = vcombine.low %v98_v46, %v102_v47 }
  0x34   :  { %v90_v56 = vld [vmem:[#allocation3] sm:$0xff]  ;;  %v72_v58 = vmul.f32 %v71_v50, %v69_v54  ;;  %v95_v60 = vld [vmem:[#allocation3 + $0x28] sm:$0xff]  ;;  %v2972_v63 = vcombine.low %v99_v48, %v103_v49 }
  0x35   :  { %v94_v57 = vld [vmem:[#allocation3 + $0x20] sm:$0xff]  ;;  %v2965_v1 = vcombine.high %v91_v59, %v95_v60  ;;  %v211_v5 = vld [vmem:[#allocation3 + $0x3c8] sm:$0xff]  ;;  %v2964_v9 = vcombine.low %v91_v59, %v95_v60 }
  0x36   :  { %917 = vmatpush1.bf16.msra.mxu0 %v2994_v34  ;;  %999 = vmatpush1.bf16.msra.mxu1 %v2996_v35  ;;  %v3578_v62 = vsub.f32 %v69_v54, %v72_v58  ;;  %v2963_v0 = vcombine.high %v90_v56, %v94_v57  ;;  %v210_v2 = vld [vmem:[#allocation3 + $0x3c0] sm:$0xff]  ;;  %v215_v6 = vld [vmem:[#allocation3 + $0x3e8] sm:$0xff]  ;;  %v2962_v7 = vcombine.low %v90_v56, %v94_v57  ;;  %v77_v58 = vlaneseq }
  0x37   :  { %918 = vmatprep.subr.bf16.mxu0 %v2987_v36  ;;  %1000 = vmatprep.subr.bf16.mxu1 %v2989_v37  ;;  %v214_v3 = vld [vmem:[#allocation3 + $0x3e0] sm:$0xff]  ;;  %v3085_v11 = vcombine.high %v211_v5, %v215_v6  ;;  %v203_v14 = vld [vmem:[#allocation3 + $0x388] sm:$0xff]  ;;  %v3084_v17 = vcombine.low %v211_v5, %v215_v6 }
  0x38   :  { %v85_v4 = vcombine.high %v3578_v62, %v3578_v62  ;;  %v3083_v10 = vcombine.high %v210_v2, %v214_v3  ;;  %v202_v12 = vld [vmem:[#allocation3 + $0x380] sm:$0xff]  ;;  %v207_v15 = vld [vmem:[#allocation3 + $0x3a8] sm:$0xff]  ;;  %v3082_v16 = vcombine.low %v210_v2, %v214_v3  ;;  %vm2951_vm3 = vcmp.lt.s32.totalorder %v77_v58, 256 }
  0x39   :  { %v206_v13 = vld [vmem:[#allocation3 + $0x3a0] sm:$0xff]  ;;  %v3077_v19 = vcombine.high %v203_v14, %v207_v15  ;;  %v195_v22 = vld [vmem:[#allocation3 + $0x348] sm:$0xff]  ;;  %v3076_v25 = vcombine.low %v203_v14, %v207_v15 }
  0x3a   :  { %919 = vmatpush1.bf16.msra.mxu0 %v2986_v42  ;;  %1001 = vmatpush1.bf16.msra.mxu1 %v2988_v43  ;;  %v3582_v8 = vpack.c.bf16 %v85_v4, %v85_v4  ;;  %v3075_v18 = vcombine.high %v202_v12, %v206_v13  ;;  %v194_v20 = vld [vmem:[#allocation3 + $0x340] sm:$0xff]  ;;  %v199_v23 = vld [vmem:[#allocation3 + $0x368] sm:$0xff]  ;;  %v3074_v24 = vcombine.low %v202_v12, %v206_v13  ;;  %v3587_v4 = vshrl.u32 %v77_v58, 7  ;;  %v152_v12 = vld [vmem:[#allocation3 + $0x1f0] sm:$0xff] }
  0x3b   :  { %920 = vmatprep.subr.bf16.mxu0 %v2979_v44  ;;  %1002 = vmatprep.subr.bf16.mxu1 %v2981_v45  ;;  %v198_v21 = vld [vmem:[#allocation3 + $0x360] sm:$0xff]  ;;  %v3069_v27 = vcombine.high %v195_v22, %v199_v23  ;;  %v187_v30 = vld [vmem:[#allocation3 + $0x308] sm:$0xff]  ;;  %v3068_v33 = vcombine.low %v195_v22, %v199_v23  ;;  %v3595_v23 = vpack.c.bf16 %v3578_v62, %v3578_v62 }
  0x3c   :  { %942 = vmatprep.mubr.bf16.mxu0 %v3582_v8  ;;  %1024 = vmatprep.mubr.bf16.mxu1 %v3582_v8  ;;  %v3067_v26 = vcombine.high %v194_v20, %v198_v21  ;;  %v186_v28 = vld [vmem:[#allocation3 + $0x300] sm:$0xff]  ;;  %v191_v31 = vld [vmem:[#allocation3 + $0x328] sm:$0xff]  ;;  %v3066_v32 = vcombine.low %v194_v20, %v198_v21  ;;  %v79_v15 = vsub.s32 0, %v3587_v4 }
  0x3d   :  { %v190_v29 = vld [vmem:[#allocation3 + $0x320] sm:$0xff]  ;;  %v3061_v35 = vcombine.high %v187_v30, %v191_v31  ;;  %v179_v38 = vld [vmem:[#allocation3 + $0x2c8] sm:$0xff]  ;;  %v3060_v41 = vcombine.low %v187_v30, %v191_v31  ;;  %v136_v30 = vld [vmem:[#allocation3 + $0x170] sm:$0xff] }
  0x3e   :  { %921 = vmatpush1.bf16.msra.mxu0 %v2978_v51  ;;  %1003 = vmatpush1.bf16.msra.mxu1 %v2980_v52  ;;  %v3059_v34 = vcombine.high %v186_v28, %v190_v29  ;;  %v178_v36 = vld [vmem:[#allocation3 + $0x2c0] sm:$0xff]  ;;  %v183_v39 = vld [vmem:[#allocation3 + $0x2e8] sm:$0xff]  ;;  %v3058_v40 = vcombine.low %v186_v28, %v190_v29 }
  0x3f   :  { %922 = vmatprep.subr.bf16.mxu0 %v2971_v53  ;;  %1004 = vmatprep.subr.bf16.mxu1 %v2973_v55  ;;  %v182_v37 = vld [vmem:[#allocation3 + $0x2e0] sm:$0xff]  ;;  %v3053_v43 = vcombine.high %v179_v38, %v183_v39  ;;  %v171_v46 = vld [vmem:[#allocation3 + $0x288] sm:$0xff]  ;;  %v3052_v49 = vcombine.low %v179_v38, %v183_v39 }
  0x40   :  { %v3051_v42 = vcombine.high %v178_v36, %v182_v37  ;;  %v170_v44 = vld [vmem:[#allocation3 + $0x280] sm:$0xff]  ;;  %v175_v47 = vld [vmem:[#allocation3 + $0x2a8] sm:$0xff]  ;;  %v3050_v48 = vcombine.low %v178_v36, %v182_v37  ;;  %v224_v36 = vld [vmem:[#allocation3 + $0x430] sm:$0xff] }
  0x41   :  { %v174_v45 = vld [vmem:[#allocation3 + $0x2a0] sm:$0xff]  ;;  %v3045_v52 = vcombine.high %v171_v46, %v175_v47  ;;  %v163_v55 = vld [vmem:[#allocation3 + $0x248] sm:$0xff]  ;;  %v3044_v59 = vcombine.low %v171_v46, %v175_v47  ;;  %v108_v46 = vld [vmem:[#allocation3 + $0x90] sm:$0xff] }
  0x42   :  { %923 = vmatpush1.bf16.msra.mxu0 %v2970_v61  ;;  %1005 = vmatpush1.bf16.msra.mxu1 %v2972_v63  ;;  %v3043_v51 = vcombine.high %v170_v44, %v174_v45  ;;  %v162_v53 = vld [vmem:[#allocation3 + $0x240] sm:$0xff]  ;;  %v167_v56 = vld [vmem:[#allocation3 + $0x268] sm:$0xff]  ;;  %v3042_v57 = vcombine.low %v170_v44, %v174_v45  ;;  %v112_v47 = vld [vmem:[#allocation3 + $0xb0] sm:$0xff] }
  0x43   :  { %924 = vmatprep.subr.bf16.mxu0 %v2963_v0  ;;  %1006 = vmatprep.subr.bf16.mxu1 %v2965_v1  ;;  %v166_v54 = vld [vmem:[#allocation3 + $0x260] sm:$0xff]  ;;  %v3037_v61 = vcombine.high %v163_v55, %v167_v56  ;;  %v155_v1 = vld [vmem:[#allocation3 + $0x208] sm:$0xff]  ;;  %v3036_v5 = vcombine.low %v163_v55, %v167_v56  ;;  %v100_v55 = vld [vmem:[#allocation3 + $0x50] sm:$0xff] }
  0x44   :  { %v3035_v60 = vcombine.high %v162_v53, %v166_v54  ;;  %v154_v63 = vld [vmem:[#allocation3 + $0x200] sm:$0xff]  ;;  %v159_v2 = vld [vmem:[#allocation3 + $0x228] sm:$0xff]  ;;  %v3034_v3 = vcombine.low %v162_v53, %v166_v54  ;;  %v104_v56 = vld [vmem:[#allocation3 + $0x70] sm:$0xff] }
  0x45   :  { %v158_v0 = vld [vmem:[#allocation3 + $0x220] sm:$0xff]  ;;  %v219_v21 = vld [vmem:[#allocation3 + $0x408] sm:$0xff] }
  0x46   :  { %925 = vmatpush1.bf16.msra.mxu0 %v2962_v7  ;;  %1007 = vmatpush1.bf16.msra.mxu1 %v2964_v9  ;;  %v3027_v6 = vcombine.high %v154_v63, %v158_v0  ;;  %v3029_v7 = vcombine.high %v155_v1, %v159_v2  ;;  %v218_v9 = vld [vmem:[#allocation3 + $0x400] sm:$0xff]  ;;  %v3026_v13 = vcombine.low %v154_v63, %v158_v0  ;;  %v223_v22 = vld [vmem:[#allocation3 + $0x428] sm:$0xff]  ;;  %v92_v63 = vld [vmem:[#allocation3 + $0x10] sm:$0xff] }
  0x47   :  { %926 = vmatprep.subr.bf16.mxu0 %v3083_v10  ;;  %1008 = vmatprep.subr.bf16.mxu1 %v3085_v11  ;;  %v222_v10 = vld [vmem:[#allocation3 + $0x420] sm:$0xff]  ;;  %v148_v11 = vld [vmem:[#allocation3 + $0x1d0] sm:$0xff]  ;;  %v3093_v29 = vcombine.high %v219_v21, %v223_v22  ;;  %v3092_v39 = vcombine.low %v219_v21, %v223_v22 }
  0x48   :  { %v68_v14 = vld [vmem:[%s3745_s1] sm:$0x1]  ;;  %v3023_v20 = vcombine.high %v148_v11, %v152_v12  ;;  %v96_v0 = vld [vmem:[#allocation3 + $0x30] sm:$0xff] }
  0x4a   :  { %927 = vmatpush2.bf16.msra.mxu0 %v3082_v16  ;;  %1009 = vmatpush2.bf16.msra.mxu1 %v3084_v17  ;;  %v3028_v16 = vcombine.low %v155_v1, %v159_v2  ;;  %v3091_v17 = vcombine.high %v218_v9, %v222_v10  ;;  %v2975_v1 = vcombine.high %v100_v55, %v104_v56 }
  0x4b   :  { %928 = vmatprep.subr.bf16.mxu0 %v3075_v18  ;;  %1010 = vmatprep.subr.bf16.mxu1 %v3077_v19  ;;  %v140_v18 = vld [vmem:[#allocation3 + $0x190] sm:$0xff] }
  0x4c   :  { %v144_v19 = vld [vmem:[#allocation3 + $0x1b0] sm:$0xff] }
  0x4d   :  { %v3015_v28 = vcombine.high %v140_v18, %v144_v19  ;;  %v3014_v31 = vcombine.low %v140_v18, %v144_v19  ;;  %v204_v18 = vld [vmem:[#allocation3 + $0x390] sm:$0xff] }
  0x4e   :  { %929 = vmatpush2.bf16.msra.mxu0 %v3074_v24  ;;  %1011 = vmatpush2.bf16.msra.mxu1 %v3076_v25  ;;  %v3090_v24 = vcombine.low %v218_v9, %v222_v10  ;;  %v80_v25 = vrot.slane %v68_v14, %v79_v15  ;;  %v212_v9 = vld [vmem:[#allocation3 + $0x3d0] sm:$0xff] }
  0x4f   :  { %930 = vmatprep.subr.bf16.mxu0 %v3067_v26  ;;  %1012 = vmatprep.subr.bf16.mxu1 %v3069_v27  ;;  %v3022_v26 = vcombine.low %v148_v11, %v152_v12  ;;  %v132_v27 = vld [vmem:[#allocation3 + $0x150] sm:$0xff]  ;;  %v2967_v11 = vcombine.high %v92_v63, %v96_v0 }
  0x50   :  { %v83_v62 = vsel %vm82_vm0, %v68_v14, %v80_v25  ;;  %v3007_v37 = vcombine.high %v132_v27, %v136_v30  ;;  %v216_v10 = vld [vmem:[#allocation3 + $0x3f0] sm:$0xff]  ;;  %v117_v25 = vld [vmem:[#allocation3 + $0xd8] sm:$0xff] }
  0x51   :  { %v3601_v38 = vpack.c.bf16 %v83_v62, %v83_v62  ;;  %v3087_v15 = vcombine.high %v212_v9, %v216_v10  ;;  %v208_v19 = vld [vmem:[#allocation3 + $0x3b0] sm:$0xff]  ;;  %v3086_v21 = vcombine.low %v212_v9, %v216_v10 }
  0x52   :  { %931 = vmatpush2.bf16.msra.mxu0 %v3066_v32  ;;  %1013 = vmatpush2.bf16.msra.mxu1 %v3068_v33  ;;  %v3514_v32 = vmov 0   ;;  %v124_v33 = vld [vmem:[#allocation3 + $0x110] sm:$0xff] }
  0x53   :  { %932 = vmatprep.subr.bf16.mxu0 %v3059_v34  ;;  %1014 = vmatprep.subr.bf16.mxu1 %v3061_v35  ;;  %v128_v34 = vld [vmem:[#allocation3 + $0x130] sm:$0xff] }
  0x54   :  { %v220_v35 = vld [vmem:[#allocation3 + $0x410] sm:$0xff]  ;;  %v2999_v44 = vcombine.high %v124_v33, %v128_v34  ;;  %v2998_v45 = vcombine.low %v124_v33, %v128_v34  ;;  %v109_v33 = vld [vmem:[#allocation3 + $0x98] sm:$0xff] }
  0x55   :  { %v113_v34 = vld [vmem:[#allocation3 + $0xb8] sm:$0xff]  ;;  %v156_v9 = vld [vmem:[#allocation3 + $0x210] sm:$0xff] }
  0x56   :  { %933 = vmatpush2.bf16.msra.mxu0 %v3058_v40  ;;  %1015 = vmatpush2.bf16.msra.mxu1 %v3060_v41  ;;  %v3006_v40 = vcombine.low %v132_v27, %v136_v30  ;;  %v116_v41 = vld [vmem:[#allocation3 + $0xd0] sm:$0xff]  ;;  %v3078_v30 = vcombine.low %v204_v18, %v208_v19 }
  0x57   :  { %934 = vmatprep.subr.bf16.mxu0 %v3051_v42  ;;  %1016 = vmatprep.subr.bf16.mxu1 %v3053_v43  ;;  %v120_v42 = vld [vmem:[#allocation3 + $0xf0] sm:$0xff]  ;;  %v3095_v43 = vcombine.high %v220_v35, %v224_v36 }
  0x58   :  { %v2990_v53 = vcombine.low %v116_v41, %v120_v42  ;;  %v196_v27 = vld [vmem:[#allocation3 + $0x350] sm:$0xff] }
  0x59   :  { %v160_v10 = vld [vmem:[#allocation3 + $0x230] sm:$0xff] }
  0x5a   :  { %935 = vmatpush2.bf16.msra.mxu0 %v3050_v48  ;;  %1017 = vmatpush2.bf16.msra.mxu1 %v3052_v49  ;;  %v149_v48 = vld [vmem:[#allocation3 + $0x1d8] sm:$0xff] }
  0x5b   :  { %936 = vmatprep.subr.bf16.mxu0 %v3043_v51  ;;  %1018 = vmatprep.subr.bf16.mxu1 %v3045_v52  ;;  %v153_v49 = vld [vmem:[#allocation3 + $0x1f8] sm:$0xff]  ;;  %v2991_v51 = vcombine.high %v116_v41, %v120_v42  ;;  %v3094_v52 = vcombine.low %v220_v35, %v224_v36  ;;  %v188_v35 = vld [vmem:[#allocation3 + $0x310] sm:$0xff] }
  0x5c   :  { %v3025_v54 = vcombine.high %v149_v48, %v153_v49  ;;  %v3024_v2 = vcombine.low %v149_v48, %v153_v49  ;;  %v192_v36 = vld [vmem:[#allocation3 + $0x330] sm:$0xff]  ;;  %v101_v42 = vld [vmem:[#allocation3 + $0x58] sm:$0xff] }
  0x5d   :  { %v3063_v41 = vcombine.high %v188_v35, %v192_v36 }
  0x5e   :  { %937 = vmatpush2.bf16.msra.mxu0 %v3042_v57  ;;  %1019 = vmatpush2.bf16.msra.mxu1 %v3044_v59  ;;  %v2983_v57 = vcombine.high %v108_v46, %v112_v47  ;;  %v141_v59 = vld [vmem:[#allocation3 + $0x198] sm:$0xff] }
  0x5f   :  { %938 = vmatprep.subr.bf16.mxu0 %v3035_v60  ;;  %1020 = vmatprep.subr.bf16.mxu1 %v3037_v61  ;;  %v145_v60 = vld [vmem:[#allocation3 + $0x1b8] sm:$0xff]  ;;  %v2982_v61 = vcombine.low %v108_v46, %v112_v47  ;;  %v2984_v46 = vcombine.low %v109_v33, %v113_v34  ;;  %v3062_v47 = vcombine.low %v188_v35, %v192_v36  ;;  %v1279_v35 = vld [vmem:[#allocation3 + $0x580] sm:$0xff] }
  0x60   :  { %v3016_v12 = vcombine.low %v141_v59, %v145_v60  ;;  %v1283_v36 = vld [vmem:[#allocation3 + $0x5a0] sm:$0xff] }
  0x62   :  { %939 = vmatpush2.bf16.msra.mxu0 %v3034_v3  ;;  %1021 = vmatpush2.bf16.msra.mxu1 %v3036_v5  ;;  %v133_v3 = vld [vmem:[#allocation3 + $0x158] sm:$0xff] }
  0x63   :  { %940 = vmatprep.subr.bf16.mxu0 %v3027_v6  ;;  %1022 = vmatprep.subr.bf16.mxu1 %v3029_v7  ;;  %v137_v5 = vld [vmem:[#allocation3 + $0x178] sm:$0xff]  ;;  %v2974_v6 = vcombine.low %v100_v55, %v104_v56  ;;  %v3017_v7 = vcombine.high %v141_v59, %v145_v60 }
  0x64   :  { %v3009_v14 = vcombine.high %v133_v3, %v137_v5  ;;  %v213_v60 = vld [vmem:[#allocation3 + $0x3d8] sm:$0xff] }
  0x66   :  { %941 = vmatpush2.bf16.msra.mxu0 %v3026_v13  ;;  %1023 = vmatpush2.bf16.msra.mxu1 %v3028_v16  ;;  %v2966_v13 = vcombine.low %v92_v63, %v96_v0  ;;  %v125_v16 = vld [vmem:[#allocation3 + $0x118] sm:$0xff]  ;;  %v164_v63 = vld [vmem:[#allocation3 + $0x250] sm:$0xff] }
  0x67   :  { %965 = vmatprep.subr.bf16.mxu0 %v3091_v17  ;;  %1074 = vmatprep.subr.bf16.mxu1 %v3023_v20  ;;  %v129_v17 = vld [vmem:[#allocation3 + $0x138] sm:$0xff]  ;;  %v3008_v20 = vcombine.low %v133_v3, %v137_v5  ;;  %v168_v0 = vld [vmem:[#allocation3 + $0x270] sm:$0xff] }
  0x68   :  { %v3001_v22 = vcombine.high %v125_v16, %v129_v17  ;;  %v3039_v5 = vcombine.high %v164_v63, %v168_v0 }
  0x69   :  { %943 = vmatmul.mubr.bf16.vlgmr.msra.gmra.mxu0 %v3595_v23  ;;  %1025 = vmatmul.mubr.bf16.vlgmr.msra.gmra.mxu1 %v3595_v23 }
  0x6a   :  { %966 = vmatpush1.bf16.msra.mxu0 %v3090_v24  ;;  %1075 = vmatpush1.bf16.msra.mxu1 %v3022_v26  ;;  %v3079_v24 = vcombine.high %v204_v18, %v208_v19  ;;  %v121_v26 = vld [vmem:[#allocation3 + $0xf8] sm:$0xff]  ;;  %v1299_v18 = vld [vmem:[#allocation3 + $0x620] sm:$0xff] }
  0x6b   :  { %983 = vmatprep.mubr.bf16.mxu0 %v3514_v32  ;;  %1076 = vmatprep.subr.bf16.mxu1 %v3015_v28  ;;  %v200_v28 = vld [vmem:[#allocation3 + $0x370] sm:$0xff]  ;;  %v2993_v62 = vcombine.high %v117_v25, %v121_v26 }
  0x6c   :  { %1047 = vmatprep.subr.bf16.mxu0 %v3093_v29  ;;  %1106 = vmatprep.mubr.bf16.mxu1 %v3582_v8  ;;  %v3000_v29 = vcombine.low %v125_v16, %v129_v17  ;;  %v201_v16 = vld [vmem:[#allocation3 + $0x378] sm:$0xff]  ;;  %v1295_v17 = vld [vmem:[#allocation3 + $0x600] sm:$0xff] }
  0x6e   :  { %1077 = vmatpush1.bf16.msra.mxu1 %v3014_v31  ;;  %v3071_v31 = vcombine.high %v196_v27, %v200_v28 }
  0x6f   :  { %1078 = vmatprep.subr.bf16.mxu1 %v3007_v37  ;;  %v2992_v37 = vcombine.low %v117_v25, %v121_v26  ;;  %v193_v25 = vld [vmem:[#allocation3 + $0x338] sm:$0xff]  ;;  %v1287_v26 = vld [vmem:[#allocation3 + $0x5c0] sm:$0xff] }
  0x71   :  { %3098 = vmatmul.mubr.msk.bf16.vlgmr.msra.gmra.mxu0 %vm906_vm1, %v3601_v38 }
  0x72   :  { %1048 = vmatpush1.bf16.msra.mxu0 %v3092_v39  ;;  %1065 = vmatprep.mubr.bf16.mxu0 %v3514_v32  ;;  %v3070_v39 = vcombine.low %v196_v27, %v200_v28  ;;  %v1291_v27 = vld [vmem:[#allocation3 + $0x5e0] sm:$0xff] }
  0x73   :  { %1079 = vmatpush1.bf16.msra.mxu1 %v3006_v40  ;;  %1129 = vmatprep.subr.bf16.mxu0 %v3095_v43  ;;  %v2985_v40 = vcombine.high %v109_v33, %v113_v34  ;;  %v105_v43 = vld [vmem:[#allocation3 + $0x78] sm:$0xff]  ;;  %v3614_v34 = vshrl.u32 %v3582_v8, 16 }
  0x74   :  { %1080 = vmatprep.subr.bf16.mxu1 %v2999_v44  ;;  %v180_v44 = vld [vmem:[#allocation3 + $0x2d0] sm:$0xff]  ;;  %v2977_v48 = vcombine.high %v101_v42, %v105_v43  ;;  %v2976_v55 = vcombine.low %v101_v42, %v105_v43  ;;  %v185_v33 = vld [vmem:[#allocation3 + $0x2f8] sm:$0xff] }
  0x75   :  { %v173_v42 = vld [vmem:[#allocation3 + $0x298] sm:$0xff] }
  0x76   :  { %v177_v43 = vld [vmem:[#allocation3 + $0x2b8] sm:$0xff] }
  0x77   :  { %1081 = vmatpush1.bf16.msra.mxu1 %v2998_v45  ;;  %v184_v45 = vld [vmem:[#allocation3 + $0x2f0] sm:$0xff] }
  0x78   :  { %1082 = vmatprep.subr.bf16.mxu1 %v2991_v51  ;;  %v3055_v49 = vcombine.high %v180_v44, %v184_v45  ;;  %v93_v51 = vld [vmem:[#allocation3 + $0x18] sm:$0xff]  ;;  %v3054_v56 = vcombine.low %v180_v44, %v184_v45  ;;  %v1271_v44 = vld [vmem:[#allocation3 + $0x540] sm:$0xff] }
  0x79   :  { %3099 = vmatmul.mubr.msk.bf16.vlgmr.msra.gmra.mxu0 %vm906_vm1, %v3601_v38  ;;  %v1275_v45 = vld [vmem:[#allocation3 + $0x560] sm:$0xff] }
  0x7a   :  { %1130 = vmatpush1.bf16.msra.mxu0 %v3094_v52  ;;  %1147 = vmatprep.mubr.bf16.mxu0 %v3514_v32  ;;  %v97_v52 = vld [vmem:[#allocation3 + $0x38] sm:$0xff] }
  0x7b   :  { %1083 = vmatpush1.bf16.msra.mxu1 %v2990_v53  ;;  %1156 = vmatprep.subr.bf16.mxu0 %v3025_v54  ;;  %v172_v53 = vld [vmem:[#allocation3 + $0x290] sm:$0xff] }
  0x7c   :  { %1084 = vmatprep.subr.bf16.mxu1 %v2983_v57  ;;  %v176_v54 = vld [vmem:[#allocation3 + $0x2b0] sm:$0xff]  ;;  %v2969_v57 = vcombine.high %v93_v51, %v97_v52 }
  0x7d   :  { %v3047_v59 = vcombine.high %v172_v53, %v176_v54 }
  0x7f   :  { %1085 = vmatpush1.bf16.msra.mxu1 %v2982_v61  ;;  %v217_v61 = vld [vmem:[#allocation3 + $0x3f8] sm:$0xff] }
  0x80   :  { %1086 = vmatprep.subr.bf16.mxu1 %v2975_v1  ;;  %v2968_v1 = vcombine.low %v93_v51, %v97_v52  ;;  %v3089_v3 = vcombine.high %v213_v60, %v217_v61  ;;  %v169_v51 = vld [vmem:[#allocation3 + $0x278] sm:$0xff]  ;;  %v1263_v52 = vld [vmem:[#allocation3 + $0x500] sm:$0xff] }
  0x81   :  { %3100 = vmatmul.mubr.msk.bf16.vlgmr.msra.gmra.mxu0 %vm906_vm1, %v3601_v38 }
  0x82   :  { %1157 = vmatpush1.bf16.msra.mxu0 %v3024_v2  ;;  %1188 = vmatprep.mubr.bf16.mxu0 %v3582_v8  ;;  %v3046_v2 = vcombine.low %v172_v53, %v176_v54  ;;  %v1267_v53 = vld [vmem:[#allocation3 + $0x520] sm:$0xff]  ;;  %v3048_v54 = vcombine.low %v173_v42, %v177_v43 }
  0x83   :  { %1087 = vmatpush1.bf16.msra.mxu1 %v2974_v6  ;;  %1158 = vmatprep.subr.bf16.mxu0 %v3017_v7  ;;  %v205_v6 = vld [vmem:[#allocation3 + $0x398] sm:$0xff] }
  0x84   :  { %1088 = vmatprep.subr.bf16.mxu1 %v2967_v11  ;;  %v209_v7 = vld [vmem:[#allocation3 + $0x3b8] sm:$0xff]  ;;  %v3088_v11 = vcombine.low %v213_v60, %v217_v61  ;;  %v1255_v61 = vld [vmem:[#allocation3 + $0x4c0] sm:$0xff] }
  0x85   :  { %v3080_v19 = vcombine.low %v205_v6, %v209_v7  ;;  %v161_v60 = vld [vmem:[#allocation3 + $0x238] sm:$0xff] }
  0x86   :  { %1159 = vmatpush1.bf16.msra.mxu0 %v3016_v12  ;;  %v3038_v12 = vcombine.low %v164_v63, %v168_v0  ;;  %v1259_v63 = vld [vmem:[#allocation3 + $0x4e0] sm:$0xff] }
  0x87   :  { %1089 = vmatpush1.bf16.msra.mxu1 %v2966_v13  ;;  %1160 = vmatprep.subr.bf16.mxu0 %v3009_v14  ;;  %v3081_v13 = vcombine.high %v205_v6, %v209_v7  ;;  %v3031_v14 = vcombine.high %v156_v9, %v160_v10  ;;  %v225_v6 = vld [vmem:[#allocation3 + $0x438] sm:$0xff]  ;;  %v1247_v7 = vld [vmem:[#allocation3 + $0x480] sm:$0xff] }
  0x88   :  { %1090 = vmatprep.subr.bf16.mxu1 %v3087_v15  ;;  %v197_v15 = vld [vmem:[#allocation3 + $0x358] sm:$0xff] }
  0x89   :  { %v3072_v28 = vcombine.low %v197_v15, %v201_v16 }
  0x8a   :  { %1161 = vmatpush1.bf16.msra.mxu0 %v3008_v20  ;;  %v3030_v20 = vcombine.low %v156_v9, %v160_v10  ;;  %v1251_v9 = vld [vmem:[#allocation3 + $0x4a0] sm:$0xff] }
  0x8b   :  { %1091 = vmatpush2.bf16.msra.mxu1 %v3086_v21  ;;  %1162 = vmatprep.subr.bf16.mxu0 %v3001_v22  ;;  %v3073_v21 = vcombine.high %v197_v15, %v201_v16  ;;  %v3159_v22 = vcombine.high %v1295_v17, %v1299_v18  ;;  %v1371_v15 = vld [vmem:[#allocation3 + $0x860] sm:$0xff] }
  0x8c   :  { %1092 = vmatprep.subr.bf16.mxu1 %v3079_v24  ;;  %v189_v24 = vld [vmem:[#allocation3 + $0x318] sm:$0xff]  ;;  %v1239_v16 = vld [vmem:[#allocation3 + $0x440] sm:$0xff] }
  0x8e   :  { %1163 = vmatpush1.bf16.msra.mxu0 %v3000_v29  ;;  %v3158_v29 = vcombine.low %v1295_v17, %v1299_v18  ;;  %v1243_v17 = vld [vmem:[#allocation3 + $0x460] sm:$0xff] }
  0x8f   :  { %1093 = vmatpush2.bf16.msra.mxu1 %v3078_v30  ;;  %1164 = vmatprep.subr.bf16.mxu0 %v2993_v62  ;;  %v3065_v30 = vcombine.high %v189_v24, %v193_v25  ;;  %v3151_v62 = vcombine.high %v1287_v26, %v1291_v27 }
  0x90   :  { %1094 = vmatprep.subr.bf16.mxu1 %v3071_v31  ;;  %v181_v31 = vld [vmem:[#allocation3 + $0x2d8] sm:$0xff] }
  0x91   :  { %v3056_v8 = vcombine.low %v181_v31, %v185_v33 }
  0x92   :  { %1165 = vmatpush1.bf16.msra.mxu0 %v2992_v37  ;;  %v3064_v37 = vcombine.low %v189_v24, %v193_v25  ;;  %v1363_v24 = vld [vmem:[#allocation3 + $0x820] sm:$0xff]  ;;  %v3102_v25 = vcombine.low %v1239_v16, %v1243_v17 }
  0x93   :  { %1095 = vmatpush2.bf16.msra.mxu1 %v3070_v39  ;;  %1166 = vmatprep.subr.bf16.mxu0 %v2985_v40  ;;  %v3150_v39 = vcombine.low %v1287_v26, %v1291_v27  ;;  %v3057_v40 = vcombine.high %v181_v31, %v185_v33  ;;  %v1296_v27 = vld [vmem:[#allocation3 + $0x608] sm:$0xff] }
  0x94   :  { %1096 = vmatprep.subr.bf16.mxu1 %v3063_v41  ;;  %v3143_v41 = vcombine.high %v1279_v35, %v1283_v36 }
  0x96   :  { %1167 = vmatpush1.bf16.msra.mxu0 %v2984_v46  ;;  %v3142_v46 = vcombine.low %v1279_v35, %v1283_v36  ;;  %v1343_v36 = vld [vmem:[#allocation3 + $0x780] sm:$0xff] }
  0x97   :  { %1097 = vmatpush2.bf16.msra.mxu1 %v3062_v47  ;;  %1168 = vmatprep.subr.bf16.mxu0 %v2977_v48  ;;  %v3049_v47 = vcombine.high %v173_v42, %v177_v43  ;;  %v3135_v48 = vcombine.high %v1271_v44, %v1275_v45  ;;  %v1292_v42 = vld [vmem:[#allocation3 + $0x5e8] sm:$0xff]  ;;  %v3624_v43 = vshrl.u32 %v3601_v38, 16 }
  0x98   :  { %1098 = vmatprep.subr.bf16.mxu1 %v3055_v49  ;;  %v165_v49 = vld [vmem:[#allocation3 + $0x258] sm:$0xff] }
  0x99   :  { %v3040_v0 = vcombine.low %v165_v49, %v169_v51 }
  0x9a   :  { %1169 = vmatpush1.bf16.msra.mxu0 %v2976_v55  ;;  %v3134_v55 = vcombine.low %v1271_v44, %v1275_v45  ;;  %v1335_v44 = vld [vmem:[#allocation3 + $0x740] sm:$0xff] }
  0x9b   :  { %1099 = vmatpush2.bf16.msra.mxu1 %v3054_v56  ;;  %1170 = vmatprep.subr.bf16.mxu0 %v2969_v57  ;;  %v3041_v56 = vcombine.high %v165_v49, %v169_v51  ;;  %v3127_v57 = vcombine.high %v1263_v52, %v1267_v53  ;;  %v1339_v45 = vld [vmem:[#allocation3 + $0x760] sm:$0xff]  ;;  %v1280_v49 = vld [vmem:[#allocation3 + $0x588] sm:$0xff] }
  0x9c   :  { %1100 = vmatprep.subr.bf16.mxu1 %v3047_v59  ;;  %v157_v59 = vld [vmem:[#allocation3 + $0x218] sm:$0xff]  ;;  %v1284_v51 = vld [vmem:[#allocation3 + $0x5a8] sm:$0xff] }
  0x9d   :  { %v3032_v10 = vcombine.low %v157_v59, %v161_v60 }
  0x9e   :  { %1171 = vmatpush1.bf16.msra.mxu0 %v2968_v1  ;;  %v3126_v1 = vcombine.low %v1263_v52, %v1267_v53  ;;  %v1327_v52 = vld [vmem:[#allocation3 + $0x700] sm:$0xff] }
  0x9f   :  { %1101 = vmatpush2.bf16.msra.mxu1 %v3046_v2  ;;  %1172 = vmatprep.subr.bf16.mxu0 %v3089_v3  ;;  %v3033_v2 = vcombine.high %v157_v59, %v161_v60  ;;  %v3119_v3 = vcombine.high %v1255_v61, %v1259_v63  ;;  %v1331_v53 = vld [vmem:[#allocation3 + $0x720] sm:$0xff]  ;;  %v1276_v59 = vld [vmem:[#allocation3 + $0x568] sm:$0xff] }
  0xa0   :  { %1102 = vmatprep.subr.bf16.mxu1 %v3039_v5  ;;  %v221_v5 = vld [vmem:[#allocation3 + $0x418] sm:$0xff]  ;;  %v1319_v60 = vld [vmem:[#allocation3 + $0x6c0] sm:$0xff] }
  0xa1   :  { %v3096_v18 = vcombine.low %v221_v5, %v225_v6 }
  0xa2   :  { %1173 = vmatpush2.bf16.msra.mxu0 %v3088_v11  ;;  %v3118_v11 = vcombine.low %v1255_v61, %v1259_v63  ;;  %v1323_v61 = vld [vmem:[#allocation3 + $0x6e0] sm:$0xff]  ;;  %v3144_v63 = vcombine.low %v1280_v49, %v1284_v51 }
  0xa3   :  { %1103 = vmatpush2.bf16.msra.mxu1 %v3038_v12  ;;  %1174 = vmatprep.subr.bf16.mxu0 %v3081_v13  ;;  %v3097_v12 = vcombine.high %v221_v5, %v225_v6  ;;  %v3111_v13 = vcombine.high %v1247_v7, %v1251_v9  ;;  %v1268_v5 = vld [vmem:[#allocation3 + $0x528] sm:$0xff]  ;;  %v1311_v6 = vld [vmem:[#allocation3 + $0x680] sm:$0xff] }
  0xa4   :  { %1104 = vmatprep.subr.bf16.mxu1 %v3031_v14  ;;  %v1367_v14 = vld [vmem:[#allocation3 + $0x840] sm:$0xff] }
  0xa6   :  { %1175 = vmatpush2.bf16.msra.mxu0 %v3080_v19  ;;  %v3110_v19 = vcombine.low %v1247_v7, %v1251_v9  ;;  %v1315_v7 = vld [vmem:[#allocation3 + $0x6a0] sm:$0xff] }
  0xa7   :  { %1105 = vmatpush2.bf16.msra.mxu1 %v3030_v20  ;;  %1176 = vmatprep.subr.bf16.mxu0 %v3073_v21  ;;  %v3231_v20 = vcombine.high %v1367_v14, %v1371_v15  ;;  %v3103_v21 = vcombine.high %v1239_v16, %v1243_v17  ;;  %v1307_v16 = vld [vmem:[#allocation3 + $0x660] sm:$0xff] }
  0xa8   :  { %2068 = vmatprep.subr.bf16.mxu1 %v3159_v22  ;;  %v1359_v22 = vld [vmem:[#allocation3 + $0x800] sm:$0xff] }
  0xa9   :  { %v3223_v26 = vcombine.high %v1359_v22, %v1363_v24  ;;  %v3222_v31 = vcombine.low %v1359_v22, %v1363_v24  ;;  %v1252_v22 = vld [vmem:[#allocation3 + $0x4a8] sm:$0xff] }
  0xaa   :  { %1107 = vmatmul.mubr.bf16.vlgmr.msra.gmra.mxu1 %v3595_v23  ;;  %1177 = vmatpush2.bf16.msra.mxu0 %v3072_v28  ;;  %v1300_v28 = vld [vmem:[#allocation3 + $0x628] sm:$0xff] }
  0xab   :  { %2069 = vmatpush1.bf16.msra.mxu1 %v3158_v29  ;;  %1178 = vmatprep.subr.bf16.mxu0 %v3065_v30  ;;  %v1351_v29 = vld [vmem:[#allocation3 + $0x7c0] sm:$0xff]  ;;  %v3161_v33 = vcombine.high %v1296_v27, %v1300_v28  ;;  %v1368_v24 = vld [vmem:[#allocation3 + $0x848] sm:$0xff] }
  0xac   :  { %2070 = vmatprep.subr.bf16.mxu1 %v3151_v62  ;;  %2100 = vmatprep.mubr.bf16.mxu1 %v3614_v34  ;;  %v1355_v30 = vld [vmem:[#allocation3 + $0x7e0] sm:$0xff]  ;;  %v3230_v62 = vcombine.low %v1367_v14, %v1371_v15  ;;  %v1260_v14 = vld [vmem:[#allocation3 + $0x4e8] sm:$0xff] }
  0xad   :  { %v3215_v35 = vcombine.high %v1351_v29, %v1355_v30  ;;  %v1303_v15 = vld [vmem:[#allocation3 + $0x640] sm:$0xff] }
  0xae   :  { %1179 = vmatpush2.bf16.msra.mxu0 %v3064_v37  ;;  %v1347_v37 = vld [vmem:[#allocation3 + $0x7a0] sm:$0xff] }
  0xaf   :  { %2071 = vmatpush1.bf16.msra.mxu1 %v3150_v39  ;;  %1180 = vmatprep.subr.bf16.mxu0 %v3057_v40  ;;  %v3214_v39 = vcombine.low %v1351_v29, %v1355_v30  ;;  %v3207_v40 = vcombine.high %v1343_v36, %v1347_v37  ;;  %v1240_v29 = vld [vmem:[#allocation3 + $0x448] sm:$0xff] }
  0xb0   :  { %2072 = vmatprep.subr.bf16.mxu1 %v3143_v41  ;;  %v1288_v41 = vld [vmem:[#allocation3 + $0x5c8] sm:$0xff] }
  0xb1   :  { %v1244_v30 = vld [vmem:[#allocation3 + $0x468] sm:$0xff] }
  0xb2   :  { %1181 = vmatpush2.bf16.msra.mxu0 %v3056_v8  ;;  %v3160_v8 = vcombine.low %v1296_v27, %v1300_v28  ;;  %v3166_v27 = vcombine.low %v1303_v15, %v1307_v16 }
  0xb3   :  { %2073 = vmatpush1.bf16.msra.mxu1 %v3142_v46  ;;  %1182 = vmatprep.subr.bf16.mxu0 %v3049_v47  ;;  %v3206_v46 = vcombine.low %v1343_v36, %v1347_v37  ;;  %v3153_v47 = vcombine.high %v1288_v41, %v1292_v42  ;;  %v3630_v36 = vshrl.u32 %v3595_v23, 16  ;;  %v3105_v37 = vcombine.high %v1240_v29, %v1244_v30 }
  0xb4   :  { %2074 = vmatprep.subr.bf16.mxu1 %v3135_v48  ;;  %v3199_v48 = vcombine.high %v1335_v44, %v1339_v45 }
  0xb6   :  { %1183 = vmatpush2.bf16.msra.mxu0 %v3048_v54  ;;  %v3152_v54 = vcombine.low %v1288_v41, %v1292_v42  ;;  %v1364_v41 = vld [vmem:[#allocation3 + $0x828] sm:$0xff] }
  0xb7   :  { %2075 = vmatpush1.bf16.msra.mxu1 %v3134_v55  ;;  %1184 = vmatprep.subr.bf16.mxu0 %v3041_v56  ;;  %v3145_v55 = vcombine.high %v1280_v49, %v1284_v51  ;;  %v3191_v56 = vcombine.high %v1327_v52, %v1331_v53 }
  0xb8   :  { %2076 = vmatprep.subr.bf16.mxu1 %v3127_v57  ;;  %v1272_v57 = vld [vmem:[#allocation3 + $0x548] sm:$0xff] }
  0xb9   :  { %v3136_v9 = vcombine.low %v1272_v57, %v1276_v59 }
  0xba   :  { %1185 = vmatpush2.bf16.msra.mxu0 %v3040_v0  ;;  %v3190_v0 = vcombine.low %v1327_v52, %v1331_v53  ;;  %v1344_v53 = vld [vmem:[#allocation3 + $0x788] sm:$0xff] }
  0xbb   :  { %2077 = vmatpush1.bf16.msra.mxu1 %v3126_v1  ;;  %1186 = vmatprep.subr.bf16.mxu0 %v3033_v2  ;;  %v3137_v1 = vcombine.high %v1272_v57, %v1276_v59  ;;  %v3183_v2 = vcombine.high %v1319_v60, %v1323_v61 }
  0xbc   :  { %2078 = vmatprep.subr.bf16.mxu1 %v3119_v3  ;;  %v1264_v3 = vld [vmem:[#allocation3 + $0x508] sm:$0xff] }
  0xbd   :  { %v3128_v17 = vcombine.low %v1264_v3, %v1268_v5 }
  0xbe   :  { %1187 = vmatpush2.bf16.msra.mxu0 %v3032_v10  ;;  %v3182_v10 = vcombine.low %v1319_v60, %v1323_v61  ;;  %v1336_v61 = vld [vmem:[#allocation3 + $0x748] sm:$0xff] }
  0xbf   :  { %2079 = vmatpush1.bf16.msra.mxu1 %v3118_v11  ;;  %1211 = vmatprep.subr.bf16.mxu0 %v3097_v12  ;;  %v3129_v11 = vcombine.high %v1264_v3, %v1268_v5  ;;  %v3175_v12 = vcombine.high %v1311_v6, %v1315_v7 }
  0xc0   :  { %2080 = vmatprep.subr.bf16.mxu1 %v3111_v13  ;;  %v1256_v13 = vld [vmem:[#allocation3 + $0x4c8] sm:$0xff] }
  0xc1   :  { %1189 = vmatmul.mubr.bf16.vlgmr.msra.gmra.mxu0 %v3595_v23  ;;  %v1352_v23 = vld [vmem:[#allocation3 + $0x7c8] sm:$0xff] }
  0xc2   :  { %1212 = vmatpush1.bf16.msra.mxu0 %v3096_v18  ;;  %1229 = vmatprep.mubr.bf16.mxu0 %v3514_v32  ;;  %v3174_v18 = vcombine.low %v1311_v6, %v1315_v7  ;;  %v1328_v7 = vld [vmem:[#allocation3 + $0x708] sm:$0xff] }
  0xc3   :  { %2081 = vmatpush1.bf16.msra.mxu1 %v3110_v19  ;;  %2123 = vmatprep.subr.bf16.mxu0 %v3231_v20  ;;  %v3121_v19 = vcombine.high %v1256_v13, %v1260_v14  ;;  %v3167_v20 = vcombine.high %v1303_v15, %v1307_v16  ;;  %v1320_v16 = vld [vmem:[#allocation3 + $0x6c8] sm:$0xff] }
  0xc4   :  { %2082 = vmatprep.subr.bf16.mxu1 %v3103_v21  ;;  %v1248_v21 = vld [vmem:[#allocation3 + $0x488] sm:$0xff] }
  0xc5   :  { %v3113_v28 = vcombine.high %v1248_v21, %v1252_v22 }
  0xc7   :  { %2083 = vmatpush1.bf16.msra.mxu1 %v3102_v25  ;;  %v1372_v25 = vld [vmem:[#allocation3 + $0x868] sm:$0xff] }
  0xc8   :  { %2084 = vmatprep.subr.bf16.mxu1 %v3223_v26  ;;  %v3120_v26 = vcombine.low %v1256_v13, %v1260_v14 }
  0xc9   :  { %3101 = vmatmul.mubr.msk.bf16.vlgmr.msra.gmra.mxu0 %vm906_vm1, %v3601_v38  ;;  %v3198_v38 = vcombine.low %v1335_v44, %v1339_v45  ;;  %v3104_v44 = vcombine.low %v1240_v29, %v1244_v30 }
  0xca   :  { %2124 = vmatpush1.bf16.msra.mxu0 %v3230_v62  ;;  %2141 = vmatprep.mubr.bf16.mxu0 %v3514_v32  ;;  %v3233_v62 = vcombine.high %v1368_v24, %v1372_v25 }
  0xcb   :  { %2085 = vmatpush2.bf16.msra.mxu1 %v3222_v31  ;;  %2150 = vmatprep.subr.bf16.mxu0 %v3161_v33  ;;  %v1297_v31 = vld [vmem:[#allocation3 + $0x610] sm:$0xff] }
  0xcc   :  { %2086 = vmatprep.subr.bf16.mxu1 %v3215_v35  ;;  %v1301_v33 = vld [vmem:[#allocation3 + $0x630] sm:$0xff]  ;;  %v3112_v35 = vcombine.low %v1248_v21, %v1252_v22 }
  0xcd   :  { %v3163_v42 = vcombine.high %v1297_v31, %v1301_v33  ;;  %v3162_v49 = vcombine.low %v1297_v31, %v1301_v33  ;;  %v1304_v33 = vld [vmem:[#allocation3 + $0x648] sm:$0xff] }
  0xcf   :  { %2087 = vmatpush2.bf16.msra.mxu1 %v3214_v39  ;;  %v3232_v39 = vcombine.low %v1368_v24, %v1372_v25  ;;  %v1312_v25 = vld [vmem:[#allocation3 + $0x688] sm:$0xff] }
  0xd0   :  { %2088 = vmatprep.subr.bf16.mxu1 %v3207_v40  ;;  %v1360_v40 = vld [vmem:[#allocation3 + $0x808] sm:$0xff] }
  0xd1   :  { %3238 = vmatmul.mubr.msk.bf16.vlgmr.msra.gmra.mxu0 %vm906_vm1, %v3624_v43  ;;  %v3225_v45 = vcombine.high %v1360_v40, %v1364_v41 }
  0xd2   :  { %2151 = vmatpush1.bf16.msra.mxu0 %v3160_v8  ;;  %2182 = vmatprep.mubr.bf16.mxu0 %v3614_v34  ;;  %v1356_v8 = vld [vmem:[#allocation3 + $0x7e8] sm:$0xff] }
  0xd3   :  { %2089 = vmatpush2.bf16.msra.mxu1 %v3206_v46  ;;  %2152 = vmatprep.subr.bf16.mxu0 %v3153_v47  ;;  %v1289_v46 = vld [vmem:[#allocation3 + $0x5d0] sm:$0xff]  ;;  %v3217_v51 = vcombine.high %v1352_v23, %v1356_v8 }
  0xd4   :  { %2090 = vmatprep.subr.bf16.mxu1 %v3199_v48  ;;  %v1293_v47 = vld [vmem:[#allocation3 + $0x5f0] sm:$0xff]  ;;  %v3224_v48 = vcombine.low %v1360_v40, %v1364_v41 }
  0xd5   :  { %v3155_v52 = vcombine.high %v1289_v46, %v1293_v47  ;;  %v3154_v57 = vcombine.low %v1289_v46, %v1293_v47  ;;  %v1365_v46 = vld [vmem:[#allocation3 + $0x830] sm:$0xff] }
  0xd6   :  { %2153 = vmatpush1.bf16.msra.mxu0 %v3152_v54  ;;  %v1348_v54 = vld [vmem:[#allocation3 + $0x7a8] sm:$0xff] }
  0xd7   :  { %2091 = vmatpush2.bf16.msra.mxu1 %v3198_v38  ;;  %2154 = vmatprep.subr.bf16.mxu0 %v3145_v55  ;;  %v1281_v38 = vld [vmem:[#allocation3 + $0x590] sm:$0xff]  ;;  %v3209_v59 = vcombine.high %v1344_v53, %v1348_v54 }
  0xd8   :  { %2092 = vmatprep.subr.bf16.mxu1 %v3191_v56  ;;  %v1285_v55 = vld [vmem:[#allocation3 + $0x5b0] sm:$0xff]  ;;  %v3216_v56 = vcombine.low %v1352_v23, %v1356_v8 }
  0xd9   :  { %v3147_v60 = vcombine.high %v1281_v38, %v1285_v55  ;;  %v3146_v3 = vcombine.low %v1281_v38, %v1285_v55  ;;  %v1373_v23 = vld [vmem:[#allocation3 + $0x870] sm:$0xff] }
  0xda   :  { %2155 = vmatpush1.bf16.msra.mxu0 %v3144_v63  ;;  %v1340_v63 = vld [vmem:[#allocation3 + $0x768] sm:$0xff]  ;;  %v1361_v8 = vld [vmem:[#allocation3 + $0x810] sm:$0xff] }
  0xdb   :  { %2093 = vmatpush2.bf16.msra.mxu1 %v3190_v0  ;;  %2156 = vmatprep.subr.bf16.mxu0 %v3137_v1  ;;  %v1273_v0 = vld [vmem:[#allocation3 + $0x550] sm:$0xff]  ;;  %v3201_v5 = vcombine.high %v1336_v61, %v1340_v63 }
  0xdc   :  { %2094 = vmatprep.subr.bf16.mxu1 %v3183_v2  ;;  %v1277_v1 = vld [vmem:[#allocation3 + $0x570] sm:$0xff]  ;;  %v3208_v2 = vcombine.low %v1344_v53, %v1348_v54  ;;  %v1302_v53 = vld [vmem:[#allocation3 + $0x638] sm:$0xff] }
  0xdd   :  { %v3139_v6 = vcombine.high %v1273_v0, %v1277_v1  ;;  %v3138_v13 = vcombine.low %v1273_v0, %v1277_v1  ;;  %v1353_v54 = vld [vmem:[#allocation3 + $0x7d0] sm:$0xff]  ;;  %v1290_v1 = vld [vmem:[#allocation3 + $0x5d8] sm:$0xff] }
  0xde   :  { %2157 = vmatpush1.bf16.msra.mxu0 %v3136_v9  ;;  %v1332_v9 = vld [vmem:[#allocation3 + $0x728] sm:$0xff]  ;;  %v1357_v38 = vld [vmem:[#allocation3 + $0x7f0] sm:$0xff] }
  0xdf   :  { %2095 = vmatpush2.bf16.msra.mxu1 %v3182_v10  ;;  %2158 = vmatprep.subr.bf16.mxu0 %v3129_v11  ;;  %v1265_v10 = vld [vmem:[#allocation3 + $0x510] sm:$0xff]  ;;  %v3193_v14 = vcombine.high %v1328_v7, %v1332_v9 }
  0xe0   :  { %2096 = vmatprep.subr.bf16.mxu1 %v3175_v12  ;;  %v1269_v11 = vld [vmem:[#allocation3 + $0x530] sm:$0xff]  ;;  %v3200_v12 = vcombine.low %v1336_v61, %v1340_v63  ;;  %v3218_v63 = vcombine.low %v1353_v54, %v1357_v38 }
  0xe1   :  { %v3131_v15 = vcombine.high %v1265_v10, %v1269_v11  ;;  %v3130_v21 = vcombine.low %v1265_v10, %v1269_v11  ;;  %v1349_v61 = vld [vmem:[#allocation3 + $0x7b0] sm:$0xff]  ;;  %v1282_v11 = vld [vmem:[#allocation3 + $0x598] sm:$0xff] }
  0xe2   :  { %2159 = vmatpush1.bf16.msra.mxu0 %v3128_v17  ;;  %v1324_v17 = vld [vmem:[#allocation3 + $0x6e8] sm:$0xff] }
  0xe3   :  { %2097 = vmatpush2.bf16.msra.mxu1 %v3174_v18  ;;  %2160 = vmatprep.subr.bf16.mxu0 %v3121_v19  ;;  %v1257_v18 = vld [vmem:[#allocation3 + $0x4d0] sm:$0xff]  ;;  %v3185_v22 = vcombine.high %v1320_v16, %v1324_v17  ;;  %v3184_v29 = vcombine.low %v1320_v16, %v1324_v17 }
  0xe4   :  { %2098 = vmatprep.subr.bf16.mxu1 %v3167_v20  ;;  %v1261_v19 = vld [vmem:[#allocation3 + $0x4f0] sm:$0xff]  ;;  %v3192_v20 = vcombine.low %v1328_v7, %v1332_v9 }
  0xe5   :  { %v3123_v24 = vcombine.high %v1257_v18, %v1261_v19  ;;  %v3122_v30 = vcombine.low %v1257_v18, %v1261_v19  ;;  %v1274_v19 = vld [vmem:[#allocation3 + $0x558] sm:$0xff] }
  0xe6   :  { %2161 = vmatpush1.bf16.msra.mxu0 %v3120_v26  ;;  %v1316_v26 = vld [vmem:[#allocation3 + $0x6a8] sm:$0xff] }
  0xe7   :  { %2099 = vmatpush2.bf16.msra.mxu1 %v3166_v27  ;;  %2162 = vmatprep.subr.bf16.mxu0 %v3113_v28  ;;  %v1249_v27 = vld [vmem:[#allocation3 + $0x490] sm:$0xff]  ;;  %v3176_v40 = vcombine.low %v1312_v25, %v1316_v26 }
  0xe8   :  { %2205 = vmatprep.subr.bf16.mxu1 %v3233_v62  ;;  %v1253_v28 = vld [vmem:[#allocation3 + $0x4b0] sm:$0xff]  ;;  %v3177_v62 = vcombine.high %v1312_v25, %v1316_v26 }
  0xe9   :  { %v3115_v31 = vcombine.high %v1249_v27, %v1253_v28  ;;  %v3114_v41 = vcombine.low %v1249_v27, %v1253_v28  ;;  %v1266_v28 = vld [vmem:[#allocation3 + $0x518] sm:$0xff] }
  0xea   :  { %2163 = vmatpush1.bf16.msra.mxu0 %v3112_v35  ;;  %2101 = vmatmul.mubr.bf16.vlgmr.msra.gmra.mxu1 %v3630_v36  ;;  %v1308_v35 = vld [vmem:[#allocation3 + $0x668] sm:$0xff] }
  0xeb   :  { %2164 = vmatprep.subr.bf16.mxu0 %v3105_v37  ;;  %2206 = vmatpush1.bf16.msra.mxu1 %v3232_v39  ;;  %v1241_v37 = vld [vmem:[#allocation3 + $0x450] sm:$0xff]  ;;  %v3168_v47 = vcombine.low %v1304_v33, %v1308_v35 }
  0xec   :  { %2223 = vmatprep.mubr.bf16.mxu1 %v3514_v32  ;;  %2232 = vmatprep.subr.bf16.mxu1 %v3163_v42  ;;  %v1245_v39 = vld [vmem:[#allocation3 + $0x470] sm:$0xff]  ;;  %v3169_v42 = vcombine.high %v1304_v33, %v1308_v35 }
  0xee   :  { %2165 = vmatpush1.bf16.msra.mxu0 %v3104_v44  ;;  %v3107_v44 = vcombine.high %v1241_v37, %v1245_v39 }
  0xef   :  { %2166 = vmatprep.subr.bf16.mxu0 %v3225_v45  ;;  %v1369_v45 = vld [vmem:[#allocation3 + $0x850] sm:$0xff] }
  0xf0   :  { %v3234_v55 = vcombine.low %v1369_v45, %v1373_v23 }
  0xf2   :  { %2167 = vmatpush2.bf16.msra.mxu0 %v3224_v48  ;;  %3239 = vmatmul.mubr.msk.bf16.vlgmr.msra.gmra.mxu1 %vm906_vm1, %v3624_v43  ;;  %v3106_v48 = vcombine.low %v1241_v37, %v1245_v39  ;;  %v1258_v37 = vld [vmem:[#allocation3 + $0x4d8] sm:$0xff] }
  0xf3   :  { %2233 = vmatpush1.bf16.msra.mxu1 %v3162_v49  ;;  %2168 = vmatprep.subr.bf16.mxu0 %v3217_v51  ;;  %v3235_v49 = vcombine.high %v1369_v45, %v1373_v23  ;;  %v3227_v51 = vcombine.high %v1361_v8, %v1365_v46  ;;  %v1262_v39 = vld [vmem:[#allocation3 + $0x4f8] sm:$0xff] }
  0xf4   :  { %2234 = vmatprep.subr.bf16.mxu1 %v3155_v52  ;;  %2264 = vmatprep.mubr.bf16.mxu1 %v3614_v34  ;;  %v1298_v52 = vld [vmem:[#allocation3 + $0x618] sm:$0xff]  ;;  %v3125_v45 = vcombine.high %v1258_v37, %v1262_v39 }
  0xf6   :  { %2169 = vmatpush2.bf16.msra.mxu0 %v3216_v56  ;;  %v3226_v56 = vcombine.low %v1361_v8, %v1365_v46  ;;  %v1250_v8 = vld [vmem:[#allocation3 + $0x498] sm:$0xff] }
  0xf7   :  { %2235 = vmatpush1.bf16.msra.mxu1 %v3154_v57  ;;  %2170 = vmatprep.subr.bf16.mxu0 %v3209_v59  ;;  %v3165_v57 = vcombine.high %v1298_v52, %v1302_v53  ;;  %v3219_v59 = vcombine.high %v1353_v54, %v1357_v38  ;;  %v1254_v46 = vld [vmem:[#allocation3 + $0x4b8] sm:$0xff] }
  0xf8   :  { %2236 = vmatprep.subr.bf16.mxu1 %v3147_v60  ;;  %v1345_v60 = vld [vmem:[#allocation3 + $0x790] sm:$0xff]  ;;  %v3117_v38 = vcombine.high %v1250_v8, %v1254_v46 }
  0xf9   :  { %v3211_v0 = vcombine.high %v1345_v60, %v1349_v61  ;;  %v3210_v7 = vcombine.low %v1345_v60, %v1349_v61  ;;  %v3116_v61 = vcombine.low %v1250_v8, %v1254_v46  ;;  %v1314_v46 = vld [vmem:[#allocation3 + $0x698] sm:$0xff] }
  0xfa   :  { %2171 = vmatpush2.bf16.msra.mxu0 %v3208_v2  ;;  %v1294_v2 = vld [vmem:[#allocation3 + $0x5f8] sm:$0xff] }
  0xfb   :  { %2237 = vmatpush1.bf16.msra.mxu1 %v3146_v3  ;;  %2172 = vmatprep.subr.bf16.mxu0 %v3201_v5  ;;  %v1337_v3 = vld [vmem:[#allocation3 + $0x750] sm:$0xff]  ;;  %v3157_v9 = vcombine.high %v1290_v1, %v1294_v2 }
  0xfc   :  { %2238 = vmatprep.subr.bf16.mxu1 %v3139_v6  ;;  %v1341_v5 = vld [vmem:[#allocation3 + $0x770] sm:$0xff]  ;;  %v3164_v6 = vcombine.low %v1298_v52, %v1302_v53 }
  0xfd   :  { %v3203_v10 = vcombine.high %v1337_v3, %v1341_v5  ;;  %v3202_v16 = vcombine.low %v1337_v3, %v1341_v5  ;;  %v1362_v3 = vld [vmem:[#allocation3 + $0x818] sm:$0xff] }
  0xfe   :  { %2173 = vmatpush2.bf16.msra.mxu0 %v3200_v12  ;;  %v1286_v12 = vld [vmem:[#allocation3 + $0x5b8] sm:$0xff] }
  0xff   :  { %2239 = vmatpush1.bf16.msra.mxu1 %v3138_v13  ;;  %2174 = vmatprep.subr.bf16.mxu0 %v3193_v14  ;;  %v1329_v13 = vld [vmem:[#allocation3 + $0x710] sm:$0xff]  ;;  %v3149_v17 = vcombine.high %v1282_v11, %v1286_v12  ;;  %v1366_v5 = vld [vmem:[#allocation3 + $0x838] sm:$0xff] }
 0x100   :  { %2240 = vmatprep.subr.bf16.mxu1 %v3131_v15  ;;  %v1333_v14 = vld [vmem:[#allocation3 + $0x730] sm:$0xff]  ;;  %v3156_v15 = vcombine.low %v1290_v1, %v1294_v2 }
 0x101   :  { %v3195_v18 = vcombine.high %v1329_v13, %v1333_v14  ;;  %v3194_v25 = vcombine.low %v1329_v13, %v1333_v14  ;;  %v1354_v14 = vld [vmem:[#allocation3 + $0x7d8] sm:$0xff] }
 0x102   :  { %2175 = vmatpush2.bf16.msra.mxu0 %v3192_v20  ;;  %v1278_v20 = vld [vmem:[#allocation3 + $0x578] sm:$0xff] }
 0x103   :  { %2241 = vmatpush1.bf16.msra.mxu1 %v3130_v21  ;;  %2176 = vmatprep.subr.bf16.mxu0 %v3185_v22  ;;  %v1321_v21 = vld [vmem:[#allocation3 + $0x6d0] sm:$0xff]  ;;  %v3141_v26 = vcombine.high %v1274_v19, %v1278_v20 }
 0x104   :  { %2242 = vmatprep.subr.bf16.mxu1 %v3123_v24  ;;  %v1325_v22 = vld [vmem:[#allocation3 + $0x6f0] sm:$0xff]  ;;  %v3148_v24 = vcombine.low %v1282_v11, %v1286_v12  ;;  %v3229_v12 = vcombine.high %v1362_v3, %v1366_v5 }
 0x105   :  { %v3187_v27 = vcombine.high %v1321_v21, %v1325_v22 }
 0x106   :  { %2177 = vmatpush2.bf16.msra.mxu0 %v3184_v29  ;;  %v1313_v29 = vld [vmem:[#allocation3 + $0x690] sm:$0xff] }
 0x107   :  { %2243 = vmatpush1.bf16.msra.mxu1 %v3122_v30  ;;  %2178 = vmatprep.subr.bf16.mxu0 %v3177_v62  ;;  %v1317_v30 = vld [vmem:[#allocation3 + $0x6b0] sm:$0xff]  ;;  %v3140_v62 = vcombine.low %v1274_v19, %v1278_v20  ;;  %v1346_v20 = vld [vmem:[#allocation3 + $0x798] sm:$0xff] }
 0x108   :  { %2244 = vmatprep.subr.bf16.mxu1 %v3115_v31  ;;  %v3186_v31 = vcombine.low %v1321_v21, %v1325_v22  ;;  %v3179_v35 = vcombine.high %v1313_v29, %v1317_v30  ;;  %v1350_v21 = vld [vmem:[#allocation3 + $0x7b8] sm:$0xff] }
 0x10a   :  { %2179 = vmatpush2.bf16.msra.mxu0 %v3176_v40  ;;  %v1305_v40 = vld [vmem:[#allocation3 + $0x650] sm:$0xff] }
 0x10b   :  { %2245 = vmatpush1.bf16.msra.mxu1 %v3114_v41  ;;  %2180 = vmatprep.subr.bf16.mxu0 %v3169_v42  ;;  %v1309_v41 = vld [vmem:[#allocation3 + $0x670] sm:$0xff] }
 0x10c   :  { %2246 = vmatprep.subr.bf16.mxu1 %v3107_v44  ;;  %v3178_v44 = vcombine.low %v1313_v29, %v1317_v30  ;;  %v3171_v23 = vcombine.high %v1305_v40, %v1309_v41  ;;  %v3170_v54 = vcombine.low %v1305_v40, %v1309_v41  ;;  %v3212_v30 = vcombine.low %v1346_v20, %v1350_v21  ;;  %v1322_v41 = vld [vmem:[#allocation3 + $0x6d8] sm:$0xff] }
 0x10e   :  { %2181 = vmatpush2.bf16.msra.mxu0 %v3168_v47 }
 0x10f   :  { %2247 = vmatpush1.bf16.msra.mxu1 %v3106_v48  ;;  %2287 = vmatprep.subr.bf16.mxu0 %v3235_v49  ;;  %v1370_v48 = vld [vmem:[#allocation3 + $0x858] sm:$0xff] }
 0x110   :  { %2248 = vmatprep.subr.bf16.mxu1 %v3227_v51  ;;  %v1374_v49 = vld [vmem:[#allocation3 + $0x878] sm:$0xff]  ;;  %v3124_v51 = vcombine.low %v1258_v37, %v1262_v39 }
 0x111   :  { %2183 = vmatmul.mubr.bf16.vlgmr.msra.gmra.mxu0 %v3630_v36  ;;  %v3236_v2 = vcombine.low %v1370_v48, %v1374_v49 }
 0x112   :  { %2288 = vmatpush1.bf16.msra.mxu0 %v3234_v55  ;;  %2305 = vmatprep.mubr.bf16.mxu0 %v3514_v32  ;;  %v1242_v55 = vld [vmem:[#allocation3 + $0x458] sm:$0xff] }
 0x113   :  { %2249 = vmatpush2.bf16.msra.mxu1 %v3226_v56  ;;  %2314 = vmatprep.subr.bf16.mxu0 %v3165_v57  ;;  %v1246_v56 = vld [vmem:[#allocation3 + $0x478] sm:$0xff] }
 0x114   :  { %2250 = vmatprep.subr.bf16.mxu1 %v3219_v59  ;;  %v3237_v59 = vcombine.high %v1370_v48, %v1374_v49  ;;  %v3109_v1 = vcombine.high %v1242_v55, %v1246_v56 }
 0x117   :  { %2251 = vmatpush2.bf16.msra.mxu1 %v3218_v63 }
 0x118   :  { %2252 = vmatprep.subr.bf16.mxu1 %v3211_v0 }
 0x119   :  { %3240 = vmatmul.mubr.msk.bf16.vlgmr.msra.gmra.mxu0 %vm906_vm1, %v3624_v43 }
 0x11a   :  { %2315 = vmatpush1.bf16.msra.mxu0 %v3164_v6  ;;  %2346 = vmatprep.mubr.bf16.mxu0 %v3614_v34  ;;  %v1270_v34 = vld [vmem:[#allocation3 + $0x538] sm:$0xff] }
 0x11b   :  { %2253 = vmatpush2.bf16.msra.mxu1 %v3210_v7  ;;  %2316 = vmatprep.subr.bf16.mxu0 %v3157_v9  ;;  %v3133_v33 = vcombine.high %v1266_v28, %v1270_v34  ;;  %v3132_v42 = vcombine.low %v1266_v28, %v1270_v34  ;;  %v1338_v28 = vld [vmem:[#allocation3 + $0x758] sm:$0xff] }
 0x11c   :  { %2254 = vmatprep.subr.bf16.mxu1 %v3203_v10  ;;  %v3108_v10 = vcombine.low %v1242_v55, %v1246_v56  ;;  %v1342_v34 = vld [vmem:[#allocation3 + $0x778] sm:$0xff] }
 0x11d   :  { %v3204_v39 = vcombine.low %v1338_v28, %v1342_v34 }
 0x11e   :  { %2317 = vmatpush1.bf16.msra.mxu0 %v3156_v15  ;;  %v1358_v15 = vld [vmem:[#allocation3 + $0x7f8] sm:$0xff] }
 0x11f   :  { %2255 = vmatpush2.bf16.msra.mxu1 %v3202_v16  ;;  %2318 = vmatprep.subr.bf16.mxu0 %v3149_v17  ;;  %v3228_v17 = vcombine.low %v1362_v3, %v1366_v5  ;;  %v3221_v19 = vcombine.high %v1354_v14, %v1358_v15 }
 0x120   :  { %2256 = vmatprep.subr.bf16.mxu1 %v3195_v18 }
 0x122   :  { %2319 = vmatpush1.bf16.msra.mxu0 %v3148_v24 }
 0x123   :  { %2257 = vmatpush2.bf16.msra.mxu1 %v3194_v25  ;;  %2320 = vmatprep.subr.bf16.mxu0 %v3141_v26  ;;  %v3220_v25 = vcombine.low %v1354_v14, %v1358_v15 }
 0x124   :  { %2258 = vmatprep.subr.bf16.mxu1 %v3187_v27  ;;  %v3213_v27 = vcombine.high %v1346_v20, %v1350_v21  ;;  %v3378_v21 = vld [vmem:[#allocation7 + $0x30] sm:$0xff]  }
 0x126   :  { %2321 = vmatpush1.bf16.msra.mxu0 %v3140_v62 }
 0x127   :  { %2259 = vmatpush2.bf16.msra.mxu1 %v3186_v31  ;;  %2322 = vmatprep.subr.bf16.mxu0 %v3133_v33  ;;  %v3205_v31 = vcombine.high %v1338_v28, %v1342_v34  ;;  %v1330_v33 = vld [vmem:[#allocation3 + $0x718] sm:$0xff] }
 0x128   :  { %2260 = vmatprep.subr.bf16.mxu1 %v3179_v35  ;;  %v1334_v35 = vld [vmem:[#allocation3 + $0x738] sm:$0xff] }
 0x129   :  { %v944_v47 = vpop.f32.mrf.mxu0  ;;  %v1026_v52 = vpop.f32.mrf.mxu1  ;;  %v3197_v40 = vcombine.high %v1330_v33, %v1334_v35  ;;  %v3379_v28 = vld [vmem:[#allocation7 + $0x68] sm:$0xff]  }
 0x12a   :  { %2323 = vmatpush1.bf16.msra.mxu0 %v3132_v42  ;;  %v1326_v42 = vld [vmem:[#allocation3 + $0x6f8] sm:$0xff] }
 0x12b   :  { %2261 = vmatpush2.bf16.msra.mxu1 %v3178_v44  ;;  %2324 = vmatprep.subr.bf16.mxu0 %v3125_v45  ;;  %v946_v53 = vpop.f32.mrf.mxu0  ;;  %v1028_v57 = vpop.f32.mrf.mxu1  ;;  %v3196_v45 = vcombine.low %v1330_v33, %v1334_v35  ;;  %v3189_v8 = vcombine.high %v1322_v41, %v1326_v42  ;;  %v3188_v48 = vcombine.low %v1322_v41, %v1326_v42  ;;  %v3381_v35 = vld [vmem:[#allocation7 + $0x60] sm:$0xff]  }
 0x12c   :  { %2262 = vmatprep.subr.bf16.mxu1 %v3171_v23 }
 0x12d   :  { %v948_v60 = vpop.f32.mrf.mxu0  ;;  %v1030_v63 = vpop.f32.mrf.mxu1 }
 0x12e   :  { %2325 = vmatpush1.bf16.msra.mxu0 %v3124_v51  ;;  %v1306_v51 = vld [vmem:[#allocation3 + $0x658] sm:$0xff] }
 0x12f   :  { %2263 = vmatpush2.bf16.msra.mxu1 %v3170_v54  ;;  %2326 = vmatprep.subr.bf16.mxu0 %v3117_v38  ;;  %v949_v0 = vpop.f32.mrf.mxu0  ;;  %v1031_v6 = vpop.f32.mrf.mxu1 }
 0x130   :  { %2369 = vmatprep.subr.bf16.mxu1 %v3237_v59 }
 0x131   :  { %v985_v7 = vpop.f32.mrf.mxu0 }
 0x132   :  { %2327 = vmatpush1.bf16.msra.mxu0 %v3116_v61  ;;  %2265 = vmatmul.mubr.bf16.vlgmr.msra.gmra.mxu1 %v3630_v36  ;;  %v3643_v9 = vadd.f32 %v985_v7, %v944_v47  ;;  %v1318_v47 = vld [vmem:[#allocation3 + $0x6b8] sm:$0xff] }
 0x133   :  { %2328 = vmatprep.subr.bf16.mxu0 %v3109_v1  ;;  %v987_v11 = vpop.f32.mrf.mxu0  ;;  %2370 = vmatpush1.bf16.msra.mxu1 %v3236_v2  ;;  %v3181_v49 = vcombine.high %v1314_v46, %v1318_v47 }
 0x134   :  { %v3645_v13 = vadd.f32 %v987_v11, %v946_v53  ;;  %2387 = vmatprep.mubr.bf16.mxu1 %v3514_v32  ;;  %v3180_v53 = vcombine.low %v1314_v46, %v1318_v47  ;;  %v3515_v46 = vmov 1983009808  }
 0x135   :  { %v989_v16 = vpop.f32.mrf.mxu0  ;;  %v2434_v47 = vunpack.c.l.s4 %v3515_v46 }
 0x136   :  { %2329 = vmatpush1.bf16.msra.mxu0 %v3108_v10  ;;  %v3375_v16 = vld [vmem:[#allocation7 + $0x78] sm:$0xff]  }
 0x137   :  { %2330 = vmatprep.subr.bf16.mxu0 %v3229_v12  ;;  %v990_v18 = vpop.f32.mrf.mxu0  ;;  %3281 = vmatprep.subr.bf16.mxu1 %v3375_v16 }
 0x139   :  { %v1067_v22 = vpop.f32.mrf.mxu0 }
 0x13a   :  { %2331 = vmatpush2.bf16.msra.mxu0 %v3228_v17  ;;  %v3648_v24 = vadd.f32 %v1067_v22, %v1026_v52  ;;  %3241 = vmatmul.mubr.msk.bf16.vlgmr.msra.gmra.mxu1 %vm906_vm1, %v3624_v43  ;;  %v1310_v52 = vld [vmem:[#allocation3 + $0x678] sm:$0xff]  ;;  %v3376_v17 = vld [vmem:[#allocation7 + $0x38] sm:$0xff]  }
 0x13b   :  { %2332 = vmatprep.subr.bf16.mxu0 %v3221_v19  ;;  %v1069_v26 = vpop.f32.mrf.mxu0  ;;  %v3173_v54 = vcombine.high %v1306_v51, %v1310_v52  ;;  %v3172_v38 = vcombine.low %v1306_v51, %v1310_v52  ;;  %3282 = vmatpush3.bf16.msra.mxu1 %v3376_v17  ;;  %v3377_v19 = vld [vmem:[#allocation7 + $0x70] sm:$0xff]   ;;  %v2435_v52 = vunpack.c.0.s8 %v2434_v47 }
 0x13c   :  { %v3652_v32 = vadd.f32 %v1069_v26, %v1028_v57  ;;  %3283 = vmatprep.subr.bf16.mxu1 %v3377_v19  ;;  %v3392_v51 = vld [vmem:[#allocation7 + $0xb0] sm:$0xff]  }
 0x13d   :  { %v1071_v29 = vpop.f32.mrf.mxu0 }
 0x13e   :  { %2333 = vmatpush2.bf16.msra.mxu0 %v3220_v25 }
 0x13f   :  { %2334 = vmatprep.subr.bf16.mxu0 %v3213_v27  ;;  %v1072_v62 = vpop.f32.mrf.mxu0  ;;  %3284 = vmatpush3.bf16.msra.mxu1 %v3378_v21 }
 0x140   :  { %3285 = vmatprep.subr.bf16.mxu1 %v3379_v28 }
 0x141   :  { %v1149_v37 = vpop.f32.mrf.mxu0 }
 0x142   :  { %2335 = vmatpush2.bf16.msra.mxu0 %v3212_v30  ;;  %v3380_v30 = vld [vmem:[#allocation7 + $0x28] sm:$0xff]  }
 0x143   :  { %2336 = vmatprep.subr.bf16.mxu0 %v3205_v31  ;;  %v1151_v43 = vpop.f32.mrf.mxu0  ;;  %3286 = vmatpush3.bf16.msra.mxu1 %v3380_v30 }
 0x144   :  { %3287 = vmatprep.subr.bf16.mxu1 %v3381_v35 }
 0x145   :  { %v1153_v44 = vpop.f32.mrf.mxu0 }
 0x146   :  { %2337 = vmatpush2.bf16.msra.mxu0 %v3204_v39  ;;  %v3386_v44 = vld [vmem:[#allocation7 + $0x10] sm:$0xff]  }
 0x147   :  { %2338 = vmatprep.subr.bf16.mxu0 %v3197_v40  ;;  %v1154_v23 = vpop.f32.mrf.mxu0  ;;  %v3384_v40 = vld [vmem:[#allocation7 + $0x18] sm:$0xff]  }
 0x148   :  { %v3389_v23 = vld [vmem:[#allocation7 + $0x40] sm:$0xff]  }
 0x14a   :  { %2339 = vmatpush2.bf16.msra.mxu0 %v3196_v45  ;;  %v3387_v45 = vld [vmem:[#allocation7 + $0x48] sm:$0xff]  }
 0x14b   :  { %2340 = vmatprep.subr.bf16.mxu0 %v3189_v8  ;;  %v3390_v8 = vld [vmem:[#allocation7] sm:$0xff]  }
 0x14e   :  { %2341 = vmatpush2.bf16.msra.mxu0 %v3188_v48  ;;  %v3391_v48 = vld [vmem:[#allocation7 + $0xb8] sm:$0xff]  }
 0x14f   :  { %2342 = vmatprep.subr.bf16.mxu0 %v3181_v49  ;;  %v3516_v49 = vmov 0.0  }
 0x152   :  { %2343 = vmatpush2.bf16.msra.mxu0 %v3180_v53  ;;  %v2428_v53 = vld [vmem:[#allocation5] sm:$0xff] }
 0x153   :  { %2344 = vmatprep.subr.bf16.mxu0 %v3173_v54  ;;  %v2432_v54 = vcombine.high %v2428_v53, %v2428_v53 }
 0x156   :  { %2345 = vmatpush2.bf16.msra.mxu0 %v3172_v38  ;;  %v3675_v38 = vsub.s32 %v2435_v52, %v3587_v4 }
 0x157   :  { %3321 = vmatprep.subr.bf16.mxu0 %v3516_v49 }
 0x159   :  { %2347 = vmatmul.mubr.bf16.vlgmr.msra.gmra.mxu0 %v3630_v36 }
 0x15a   :  { %3322 = vmatpush3.bf16.msra.mxu0 %v3391_v48  ;;  %3337 = vmatprep.mubr.msk.bf16.mxu0 %vm3517_vm2, %v3516_v49 }
 0x15b   :  { %3323 = vmatprep.subr.bf16.mxu0 %v3516_v49 }
 0x15e   :  { %3324 = vmatpush3.bf16.msra.mxu0 %v3392_v51 }
 0x15f   :  { %3325 = vmatprep.subr.bf16.mxu0 %v3516_v49 }
 0x16a   :  { %v1108_v55 = vpop.f32.mrf.mxu1 }
 0x16b   :  { %v3655_v56 = vadd.f32 %v1149_v37, %v1108_v55  ;;  %v3382_v37 = vld [vmem:[#allocation7 + $0x20] sm:$0xff]  }
 0x16c   :  { %v1110_v57 = vpop.f32.mrf.mxu1  ;;  %3288 = vmatpush3.bf16.msra.mxu1 %v3382_v37 }
 0x16d   :  { %v3657_v59 = vadd.f32 %v1151_v43, %v1110_v57  ;;  %v3383_v43 = vld [vmem:[#allocation7 + $0x58] sm:$0xff]   ;;  %v2446_v57 = vrot.slane %v2432_v54, %v3675_v38 }
 0x16e   :  { %v1112_v60 = vpop.f32.mrf.mxu1  ;;  %3289 = vmatprep.subr.bf16.mxu1 %v3383_v43 }
 0x170   :  { %v1113_v61 = vpop.f32.mrf.mxu1  ;;  %3290 = vmatpush3.bf16.msra.mxu1 %v3384_v40 }
 0x181   :  { %v1190_v63 = vpop.f32.mrf.mxu0 }
 0x183   :  { %v1192_v0 = vpop.f32.mrf.mxu0 }
 0x185   :  { %v1194_v1 = vpop.f32.mrf.mxu0 }
 0x186   :  { %v2448_v1 = vcombine.high %v2446_v57, %v2446_v57 }
 0x187   :  { %v1195_v2 = vpop.f32.mrf.mxu0 }
 0x189   :  { %v1231_v3 = vpop.f32.mrf.mxu0 }
 0x18a   :  { %v3659_v5 = vadd.f32 %v1231_v3, %v1190_v63 }
 0x18b   :  { %v1233_v6 = vpop.f32.mrf.mxu0 }
 0x18c   :  { %v3661_v7 = vadd.f32 %v1233_v6, %v1192_v0 }
 0x18d   :  { %v1235_v10 = vpop.f32.mrf.mxu0 }
 0x18f   :  { %v1236_v36 = vpop.f32.mrf.mxu0 }
 0x191   :  { %v2143_v11 = vpop.f32.mrf.mxu0 }
 0x193   :  { %v2145_v12 = vpop.f32.mrf.mxu0 }
 0x195   :  { %v2147_v14 = vpop.f32.mrf.mxu0 }
 0x197   :  { %v2148_v15 = vpop.f32.mrf.mxu0 }
 0x1aa   :  { %v2102_v18 = vpop.f32.mrf.mxu1 }
 0x1ab   :  { %v2144_v20 = vadd.f32 %v2143_v11, %v2102_v18 }
 0x1ac   :  { %v2104_v22 = vpop.f32.mrf.mxu1 }
 0x1ad   :  { %v2404_v25 = vrot.slane %v2144_v20, 7  ;;  %v2146_v26 = vadd.f32 %v2145_v12, %v2104_v22 }
 0x1ae   :  { %v2106_v27 = vpop.f32.mrf.mxu1 }
 0x1af   :  { %v3665_v34 = vsel %vm82_vm0, %v3643_v9, %v2404_v25  ;;  %v2405_v29 = vrot.slane %v2146_v26, 7  ;;  %v3385_v9 = vld [vmem:[#allocation7 + $0x50] sm:$0xff]  }
 0x1b0   :  { %v2107_v62 = vpop.f32.mrf.mxu1  ;;  %3291 = vmatprep.subr.bf16.mxu1 %v3385_v9 }
 0x1b1   :  { %v3669_v31 = vsel %vm82_vm0, %v3645_v13, %v2405_v29  ;;  %3292 = vmatpush3.bf16.msra.mxu1 %v3386_v44  ;;  %v3388_v13 = vld [vmem:[#allocation7 + $0x8] sm:$0xff]  }
 0x1b2   :  { %v2225_v33 = vpop.f32.mrf.mxu1  ;;  %3293 = vmatprep.subr.bf16.mxu1 %v3387_v45 }
 0x1b4   :  { %v2227_v39 = vpop.f32.mrf.mxu1 }
 0x1b5   :  { %3294 = vmatpush3.bf16.msra.mxu1 %v3388_v13 }
 0x1b6   :  { %v2229_v41 = vpop.f32.mrf.mxu1  ;;  %3295 = vmatprep.subr.bf16.mxu1 %v3389_v23 }
 0x1b8   :  { %v2230_v42 = vpop.f32.mrf.mxu1 }
 0x1b9   :  { %3296 = vmatpush3.bf16.msra.mxu1 %v3390_v8  ;;  %v2439_v8 = vrot.slane %v2428_v53, %v3675_v38 }
 0x1ba   :  { %3341 = vmatprep.subr.bf16.mxu1 %v3516_v49 }
 0x1bb   :  { %v2447_v48 = vcombine.high %v2439_v8, %v2439_v8  ;;  %v2474_v51 = vadd.f32 %v2439_v8, %v3665_v34  ;;  %v3398_v8 = vld [vmem:[#allocation7 + $0x80] sm:$0xff]  }
 0x1bd   :  { %v3242_v52 = vmul.f32 -1.442695, %v2474_v51 }
 0x1d1   :  { %v2184_v55 = vpop.f32.mrf.mxu0 }
 0x1d2   :  { %v2226_v60 = vadd.f32 %v2225_v33, %v2184_v55  ;;  %v2429_v55 = vld [vmem:[#allocation5 + $0x8] sm:$0xff] }
 0x1d3   :  { %v2186_v61 = vpop.f32.mrf.mxu0 }
 0x1d4   :  { %v2406_v63 = vrot.slane %v2226_v60, 7  ;;  %v2228_v0 = vadd.f32 %v2227_v39, %v2186_v61  ;;  %v2449_v60 = vcombine.high %v2429_v55, %v2429_v55 }
 0x1d5   :  { %v2188_v2 = vpop.f32.mrf.mxu0 }
 0x1d6   :  { %v2422_v3 = vsel %vm82_vm0, %v3648_v24, %v2406_v63  ;;  %v2407_v6 = vrot.slane %v2228_v0, 7  ;;  %v70_v24 = vld [vmem:[%s3746_s2] sm:$0xcc] }
 0x1d7   :  { %v2476_v10 = vadd.f32 %v2446_v57, %v2422_v3  ;;  %v2189_v36 = vpop.f32.mrf.mxu0 }
 0x1d8   :  { %v2423_v11 = vsel %vm82_vm0, %v3652_v32, %v2407_v6  ;;  %v74_v32 = vmul.f32 %v71_v50, %v70_v24 }
 0x1d9   :  { %v3244_v12 = vmul.f32 -1.442695, %v2476_v10  ;;  %v2477_v14 = vadd.f32 %v2448_v1, %v2423_v11  ;;  %v2307_v15 = vpop.f32.mrf.mxu0  ;;  %v2463_v1 = vrot.slane %v2449_v60, %v3675_v38 }
 0x1da   :  { %v75_v26 = vsub.f32 %v70_v24, %v74_v32 }
 0x1db   :  { %3407 = vpow2.f32 %v3244_v12  ;;  %v3245_v16 = vmul.f32 -1.442695, %v2477_v14  ;;  %v2309_v17 = vpop.f32.mrf.mxu0  ;;  %v2465_v12 = vcombine.high %v2463_v1, %v2463_v1 }
 0x1dc   :  { %v2521_v28 = vcombine.high %v75_v26, %v75_v26  ;;  %v2522_v62 = vrot.slane %v75_v26, 2 }
 0x1dd   :  { %3409 = vpow2.f32 %v3245_v16  ;;  %v2311_v18 = vpop.f32.mrf.mxu0 }
 0x1de   :  { %v2523_v39 = vrot.slane %v2521_v28, 2 }
 0x1df   :  { %v2312_v19 = vpop.f32.mrf.mxu0 }
 0x1e8   :  { %v3408_v20 = vpop.eup %3407 }
 0x1e9   :  { %v2502_v21 = vadd.f32 1.0, %v3408_v20 }
 0x1ea   :  { %v3410_v22 = vpop.eup %3409 }
 0x1eb   :  { %3411 = vrcp.f32 %v2502_v21  ;;  %v2503_v25 = vadd.f32 1.0, %v3410_v22 }
 0x1ed   :  { %3413 = vrcp.f32 %v2503_v25 }
 0x1ee   :  { %3415 = vpow2.f32 %v3242_v52 }
 0x1f2   :  { %v2266_v27 = vpop.f32.mrf.mxu1 }
 0x1f3   :  { %v2308_v29 = vadd.f32 %v2307_v15, %v2266_v27 }
 0x1f4   :  { %v2268_v30 = vpop.f32.mrf.mxu1 }
 0x1f5   :  { %v2408_v33 = vrot.slane %v2308_v29, 7  ;;  %v2310_v35 = vadd.f32 %v2309_v17, %v2268_v30 }
 0x1f6   :  { %v2270_v37 = vpop.f32.mrf.mxu1 }
 0x1f7   :  { %v2424_v43 = vsel %vm82_vm0, %v3655_v56, %v2408_v33  ;;  %v2409_v40 = vrot.slane %v2310_v35, 7  ;;  %v2475_v56 = vadd.f32 %v2447_v48, %v3669_v31  ;;  %v3401_v48 = vld [vmem:[#allocation7 + $0xe8] sm:$0xff]  }
 0x1f8   :  { %v3412_v41 = vpop.eup %3411  ;;  %v2271_v9 = vpop.f32.mrf.mxu1 }
 0x1f9   :  { %v2425_v50 = vsel %vm82_vm0, %v3657_v59, %v2409_v40  ;;  %v2526_v42 = vmul.f32 %v3412_v41, %v2522_v62  ;;  %v3243_v54 = vmul.f32 -1.442695, %v2475_v56  ;;  %v2456_v59 = vrot.slane %v2429_v55, %v3675_v38  ;;  %v2570_v56 = vld [vmem:[%s3750_s6] sm:$0x1] }
 0x1fa   :  { %v3414_v44 = vpop.eup %3413  ;;  %v2389_v45 = vpop.f32.mrf.mxu1 }
 0x1fb   :  { %v2527_v13 = vmul.f32 %v3414_v44, %v2523_v39  ;;  %3417 = vpow2.f32 %v3243_v54  ;;  %v2464_v57 = vcombine.high %v2456_v59, %v2456_v59  ;;  %v2478_v61 = vadd.f32 %v2456_v59, %v2424_v43  ;;  %v3416_v63 = vpop.eup %3415  ;;  %v3394_v44 = vld [vmem:[#allocation7 + $0xa0] sm:$0xff]  }
 0x1fc   :  { %v2391_v23 = vpop.f32.mrf.mxu1  ;;  %v2500_v6 = vadd.f32 1.0, %v3416_v63  ;;  %v3402_v63 = vld [vmem:[#allocation7 + $0xe0] sm:$0xff]  }
 0x1fd   :  { %v2479_v0 = vadd.f32 %v2464_v57, %v2425_v50  ;;  %v3246_v2 = vmul.f32 -1.442695, %v2478_v61 }
 0x1fe   :  { %v2393_v46 = vpop.f32.mrf.mxu1 }
 0x1ff   :  { %v3247_v10 = vmul.f32 -1.442695, %v2479_v0  ;;  %3419 = vpow2.f32 %v3246_v2  ;;  %v3399_v46 = vld [vmem:[#allocation7 + $0xf8] sm:$0xff]   ;;  %v3406_v2 = vld [vmem:[#allocation7 + $0xc0] sm:$0xff]  }
 0x200   :  { %v2394_v47 = vpop.f32.mrf.mxu1  ;;  %3421 = vrcp.f32 %v2500_v6  ;;  %v3403_v0 = vld [vmem:[#allocation7 + $0xd8] sm:$0xff]  }
 0x201   :  { %3423 = vpow2.f32 %v3247_v10  ;;  %v3400_v47 = vld [vmem:[#allocation7 + $0xf0] sm:$0xff]  }
 0x208   :  { %v3418_v34 = vpop.eup %3417 }
 0x209   :  { %v2501_v15 = vadd.f32 1.0, %v3418_v34 }
 0x20c   :  { %v3420_v24 = vpop.eup %3419 }
 0x20d   :  { %v3422_v21 = vpop.eup %3421  ;;  %v2504_v25 = vadd.f32 1.0, %v3420_v24 }
 0x20e   :  { %v3424_v22 = vpop.eup %3423 }
 0x20f   :  { %v2505_v28 = vadd.f32 1.0, %v3424_v22 }
 0x219   :  { %v2348_v53 = vpop.f32.mrf.mxu0 }
 0x21a   :  { %v2390_v3 = vadd.f32 %v2389_v45, %v2348_v53  ;;  %v3395_v45 = vld [vmem:[#allocation7 + $0x98] sm:$0xff]   ;;  %v3404_v53 = vld [vmem:[#allocation7 + $0xd0] sm:$0xff]  }
 0x21b   :  { %v2350_v31 = vpop.f32.mrf.mxu0 }
 0x21c   :  { %v2410_v36 = vrot.slane %v2390_v3, 7  ;;  %v2392_v11 = vadd.f32 %v2391_v23, %v2350_v31  ;;  %v3397_v23 = vld [vmem:[#allocation7 + $0x88] sm:$0xff]   ;;  %v2725_v3 = vld [vmem:[%s3750_s6 + $0x1] sm:$0x1] }
 0x21d   :  { %v2352_v14 = vpop.f32.mrf.mxu0 }
 0x21e   :  { %v2426_v16 = vsel %vm82_vm0, %v3659_v5, %v2410_v36  ;;  %v2411_v17 = vrot.slane %v2392_v11, 7  ;;  %v3518_v14 = vmov 1966171168  }
 0x21f   :  { %v2480_v18 = vadd.f32 %v2463_v1, %v2426_v16  ;;  %v2353_v19 = vpop.f32.mrf.mxu0  ;;  %v3405_v1 = vld [vmem:[#allocation7 + $0xc8] sm:$0xff]  }
 0x220   :  { %v2427_v38 = vsel %vm82_vm0, %v3661_v7, %v2411_v17  ;;  %v2832_v17 = vld [vmem:[%s3750_s6 + $0x2] sm:$0x1] }
 0x221   :  { %3425 = vtanh.f32 %v2480_v18  ;;  %v2481_v20 = vadd.f32 %v2465_v12, %v2427_v38 }
 0x222   :  { %3427 = vrcp.f32 %v2501_v15  ;;  %v2935_v15 = vunpack.c.l.s4 %v3518_v14 }
 0x223   :  { %3429 = vtanh.f32 %v2481_v20 }
 0x224   :  { %3431 = vrcp.f32 %v2504_v25  ;;  %v2936_v16 = vunpack.c.0.s8 %v2935_v15 }
 0x226   :  { %v2939_v38 = vsub.s32 %v2936_v16, %v3587_v4 }
 0x22e   :  { %v3426_v32 = vpop.eup %3425 }
 0x22f   :  { %v3428_v26 = vpop.eup %3427  ;;  %v2528_v27 = vmul.f32 %v3426_v32, %v3422_v21 }
 0x230   :  { %v3430_v5 = vpop.eup %3429 }
 0x231   :  { %v2530_v29 = vadd.f32 %v2528_v27, %v2526_v42  ;;  %v2529_v30 = vmul.f32 %v3430_v5, %v3428_v26  ;;  %v3432_v35 = vpop.eup %3431  ;;  %v3393_v42 = vld [vmem:[#allocation7 + $0xa8] sm:$0xff]  }
 0x232   :  { %3326 = vmatpush3.bf16.msra.mxu0 %v3393_v42 }
 0x233   :  { %v2925_v62 = vrot.slane %v2530_v29, 6  ;;  %v2531_v33 = vadd.f32 %v2529_v30, %v2527_v13  ;;  %3433 = vtanh.f32 %v2530_v29  ;;  %3327 = vmatprep.subr.bf16.mxu0 %v3516_v49  ;;  %v3396_v13 = vld [vmem:[#allocation7 + $0x90] sm:$0xff]  }
 0x234   :  { %3435 = vrcp.f32 %v2505_v28 }
 0x235   :  { %2929 = vst [vmem:[%s3751_s7] sm:$0xc] %v2925_v62  ;;  %3437 = vtanh.f32 %v2531_v33  ;;  %v2926_v7 = vrot.slane %v2531_v33, 6 }
 0x236   :  { %3328 = vmatpush3.bf16.msra.mxu0 %v3394_v44 }
 0x237   :  { %2930 = vst [vmem:[%s3751_s7 + $0x8] sm:$0xc] %v2926_v7  ;;  %3329 = vmatprep.subr.bf16.mxu0 %v3516_v49 }
 0x23a   :  { %3330 = vmatpush3.bf16.msra.mxu0 %v3395_v45 }
 0x23b   :  { %3331 = vmatprep.subr.bf16.mxu0 %v3516_v49 }
 0x23e   :  { %3332 = vmatpush3.bf16.msra.mxu0 %v3396_v13 }
 0x23f   :  { %3333 = vmatprep.subr.bf16.mxu0 %v3516_v49 }
 0x240   :  { %v3434_v37 = vpop.eup %3433 }
 0x241   :  { %v3436_v39 = vpop.eup %3435  ;;  %v2534_v43 = vmul.f32 %v3434_v37, %v3432_v35 }
 0x242   :  { %v3438_v40 = vpop.eup %3437  ;;  %3334 = vmatpush3.bf16.msra.mxu0 %v3397_v23 }
 0x243   :  { %v2535_v41 = vmul.f32 %v3438_v40, %v3436_v39  ;;  %2921 = vst [vmem:[%s3751_s7] sm:$0x3] %v2534_v43  ;;  %v2536_v50 = vpack.c.bf16 %v2534_v43, %v2534_v43  ;;  %3335 = vmatprep.subr.bf16.mxu0 %v3516_v49 }
 0x245   :  { %v2537_v9 = vpack.c.bf16 %v2535_v41, %v2535_v41  ;;  %2922 = vst [vmem:[%s3751_s7 + $0x8] sm:$0x3] %v2535_v41 }
 0x246   :  { %3336 = vmatpush3.bf16.msra.mxu0 %v3398_v8 }
 0x247   :  { %2699 = vmatprep.mubr.bf16.mxu1 %v2537_v9 }
 0x248   :  { %2700 = vmatmul.mubr.bf16.vlgmr.msra.gmra.mxu1 %v2536_v50 }
 0x249   :  { %3357 = vmatprep.mubr.msk.bf16.mxu1 %vm3517_vm2, %v3516_v49  ;;  %3342 = vmatpush3.bf16.msra.mxu1 %v3399_v46 }
 0x24a   :  { %3343 = vmatprep.subr.bf16.mxu1 %v3516_v49 }
 0x24d   :  { %3344 = vmatpush3.bf16.msra.mxu1 %v3400_v47 }
 0x24e   :  { %3345 = vmatprep.subr.bf16.mxu1 %v3516_v49 }
 0x251   :  { %3346 = vmatpush3.bf16.msra.mxu1 %v3401_v48 }
 0x252   :  { %3347 = vmatprep.subr.bf16.mxu1 %v3516_v49 }
 0x255   :  { %3348 = vmatpush3.bf16.msra.mxu1 %v3402_v63 }
 0x256   :  { %3349 = vmatprep.subr.bf16.mxu1 %v3516_v49 }
 0x259   :  { %3350 = vmatpush3.bf16.msra.mxu1 %v3403_v0 }
 0x25a   :  { %3351 = vmatprep.subr.bf16.mxu1 %v3516_v49 }
 0x25d   :  { %3352 = vmatpush3.bf16.msra.mxu1 %v3404_v53 }
 0x25e   :  { %3353 = vmatprep.subr.bf16.mxu1 %v3516_v49 }
 0x261   :  { %3354 = vmatpush3.bf16.msra.mxu1 %v3405_v1 }
 0x262   :  { %3355 = vmatprep.subr.bf16.mxu1 %v3516_v49 }
 0x265   :  { %3356 = vmatpush3.bf16.msra.mxu1 %v3406_v2 }
 0x308   :  { %v3297_v51 = vpop.f32.mrf.mxu1 }
 0x30a   :  { %v3298_v52 = vpop.f32.mrf.mxu1 }
 0x30b   :  { %v3299_v54 = vadd.f32 %v3298_v52, %v3297_v51 }
 0x30c   :  { %v3300_v55 = vpop.f32.mrf.mxu1 }
 0x30d   :  { %v2702_v59 = vadd.f32 %v3299_v54, %v2570_v56 }
 0x30e   :  { %v3301_v57 = vpop.f32.mrf.mxu1 }
 0x30f   :  { %3439 = vtanh.f32 %v2702_v59 }
 0x31c   :  { %v3440_v60 = vpop.eup %3439 }
 0x31d   :  { %v2708_v61 = vpack.c.bf16 %v3440_v60, %v3440_v60 }
 0x31f   :  { %3338 = vmatmul.mubr.bf16.vlgmr.msra.gmra.mxu0 %v2708_v61 }
 0x3df   :  { %v2808_v34 = vpop.f32.mrf.mxu0 }
 0x3e0   :  { %v2809_v6 = vadd.f32 %v2808_v34, %v2725_v3 }
 0x3e1   :  { %v3339_v31 = vpop.f32.mrf.mxu0 }
 0x3e2   :  { %3441 = vtanh.f32 %v2809_v6 }
 0x3e3   :  { %v2811_v10 = vpop.f32.mrf.mxu0 }
 0x3e5   :  { %v3340_v36 = vpop.f32.mrf.mxu0 }
 0x3ef   :  { %v3442_v11 = vpop.eup %3441 }
 0x3f0   :  { %v2815_v12 = vpack.c.bf16 %v3442_v11, %v3442_v11 }
 0x3f2   :  { %3358 = vmatmul.mubr.bf16.vlgmr.msra.gmra.mxu1 %v2815_v12 }
 0x4b2   :  { %v2915_v18 = vpop.f32.mrf.mxu1 }
 0x4b3   :  { %v2916_v19 = vadd.f32 %v2915_v18, %v2832_v17 }
 0x4b4   :  { %v3359_v20 = vpop.f32.mrf.mxu1 }
 0x4b5   :  { %v2933_v24 = vcombine.low %v2916_v19, %v3516_v49 }
 0x4b6   :  { %v2918_v21 = vpop.f32.mrf.mxu1 }
 0x4b7   :  { %v2940_v22 = vrot.slane %v2933_v24, %v2939_v38 }
 0x4b8   :  { %v3360_v32 = vpop.f32.mrf.mxu1 }
 0x4b9   :  { %v2947_v25 = vrot.slane %v2940_v22, %v2939_v38 }
 0x4bb   :  { %3280 = vst.msk [vmem:[%s3751_s7 + $0x4] ss:$8 sm:$0x3] %vm2951_vm3, %v2947_v25 }
 0x4bc   :  { %2960 = vsyncpa [#allocation4], 1 }
 0x4bd   :  { %2961 = vsyncpa [#allocation6], 1 }

</bundles_post_ra>
